<compile_context>
chip_gen: v5e
topology: v5e:2x2
jax: 0.10.0
libtpu: 0.0.40
codegen_flags: <defaults>
</compile_context>

<pallas_src>
import functools

import jax
import jax.numpy as jnp
from jax.experimental import pallas as pl
from jax.experimental.pallas import tpu as pltpu


def _round_up(a, b):
    return (a + b - 1) // b * b


def _padded_block_bytes(shape, dtype):
    """Conservative VMEM footprint of one block (pads minor dims to (16,128))."""
    itemsize = jnp.dtype(dtype).itemsize
    if len(shape) < 2:
        n = 1
        for s in shape:
            n *= int(s)
        return _round_up(max(n, 1) * itemsize, 4 * 128)
    lead = 1
    for s in shape[:-2]:
        lead *= int(s)
    sub = _round_up(int(shape[-2]), 16)
    lane = _round_up(int(shape[-1]), 128)
    return lead * sub * lane * itemsize


def _vmem_capacity_bytes():
    try:
        return int(pltpu.get_tpu_info().vmem_capacity_bytes)
    except Exception:
        return 64 * 2**20          # conservative fallback: v7x per-TensorCore VMEM


def _sum_block_bytes(blocks):
    return sum(_padded_block_bytes(s, d) * n for s, d, n in blocks)


def _vmem_limit_bytes(blocks):
    """blocks: iterable of (block_shape, dtype, n_buffers).

    Actual footprint + margin for Mosaic internal scratch, clamped below the
    generation's physical VMEM minus ~8 MiB headroom.
    """
    est = _sum_block_bytes(blocks)
    cap = _vmem_capacity_bytes()
    want = int(est * 1.25) + (4 << 20)
    return int(max(16 << 20, min(want, cap - (8 << 20))))


def _const_block_spec(block_shape, index_map):
    """Constant-index block: fetched once across the grid; single-buffered."""
    try:
        return pl.BlockSpec(block_shape, index_map, pipeline_mode=pl.Buffered(1))
    except Exception:  # older jax without pipeline_mode kwarg
        return pl.BlockSpec(block_shape, index_map)


# ----------------------------- Router kernel -----------------------------
def router_kernel(x_ref, w_ref, b_ref, noise_ref, noisy_ref, *, n_exp):
    # One fused MXU push for both the routing and the noise projections (same LHS).
    # Kept fully in f32: routing parity matters more than the (<1%) router FLOPs.
    x = x_ref[...]                                                        # (tm, D) f32
    fused = jnp.dot(x, w_ref[...], preferred_element_type=jnp.float32)    # (tm, 2E)
    fused = fused + b_ref[...]
    logits = fused[:, :n_exp]
    noise_logits = fused[:, n_exp:]
    noisy_ref[...] = logits + noise_ref[...] * jax.nn.softplus(noise_logits)
    # The dense softmax over all experts is dead work for the forward path
    # (top-k softmax is recomputed on the gathered logits in glue) -> not computed.


def run_router(x_f32, w_fused, b_fused, noise, *, tm):
    Tp, D = x_f32.shape
    two_e = w_fused.shape[1]
    n_exp = two_e // 2
    blocks = [((tm, D), jnp.float32, 2),
              ((D, two_e), jnp.float32, 1),       # constant index -> single-buffered
              ((1, two_e), jnp.float32, 1),
              ((tm, n_exp), jnp.float32, 2),
              ((tm, two_e), jnp.float32, 1),      # fused matmul temporary
              ((tm, n_exp), jnp.float32, 2)]      # output
    return pl.pallas_call(
        functools.partial(router_kernel, n_exp=n_exp),
        out_shape=jax.ShapeDtypeStruct((Tp, n_exp), jnp.float32),
        grid_spec=pltpu.PrefetchScalarGridSpec(
            num_scalar_prefetch=0,
            grid=(Tp // tm,),
            in_specs=[
                pl.BlockSpec((tm, D), lambda t: (t, 0)),              # x tile
                _const_block_spec((D, two_e), lambda t: (0, 0)),      # [W_route | W_noise]
                _const_block_spec((1, two_e), lambda t: (0, 0)),      # fused biases
                pl.BlockSpec((tm, n_exp), lambda t: (t, 0)),          # noise sample
            ],
            out_specs=pl.BlockSpec((tm, n_exp), lambda t: (t, 0)),
        ),
        compiler_params=pltpu.CompilerParams(
            dimension_semantics=("parallel",),
            vmem_limit_bytes=_vmem_limit_bytes(blocks)),
    )(x_f32, w_fused, b_fused, noise)


# ----------------------------- Expert kernel -----------------------------
def expert_kernel(mask_ref, x_ref, w1_ref, b1_ref, w2_ref, b2_ref, gate_ref,
                  out_ref, *, resident):
    t = pl.program_id(0)
    e = pl.program_id(1)

    # Accumulate directly into the VMEM-resident f32 output block (no scratch).
    @pl.when(e == 0)
    def _():
        out_ref[...] = jnp.zeros_like(out_ref)

    # Skip experts with no routed tokens in this tile (SMEM bitmap, scalar-prefetched).
    @pl.when(mask_ref[e, t] != 0)
    def _():
        x = x_ref[...]                                    # (tm, D)  bf16
        if resident:                                      # all experts VMEM-resident
            w1, b1 = w1_ref[e], b1_ref[e]
            w2, b2 = w2_ref[e], b2_ref[e]
        else:                                             # one expert streamed per step
            w1, b1 = w1_ref[0], b1_ref[0]
            w2, b2 = w2_ref[0], b2_ref[0]
        # TODO(synk): for large H, tile the hidden dim (chunked matmul1 -> ReLU ->
        # partial matmul2) instead of materializing the full (tm, H) f32 h.
        h = jnp.dot(x, w1, preferred_element_type=jnp.float32) + b1      # (tm, H) f32
        h = jnp.maximum(h, 0.0)                           # ReLU (f32 on the VPU)
        y = jnp.dot(h.astype(jnp.bfloat16), w2,
                    preferred_element_type=jnp.float32) + b2             # (tm, D) f32
        # Dropout omitted (eval mode).  gate == 0 for non-routed / dropped / padded tokens.
        gates = gate_ref[...]                             # (tm, E) f32, lane-dense, fetched once/tile
        lane = jax.lax.broadcasted_iota(jnp.int32, gates.shape, 1)
        g = jnp.sum(jnp.where(lane == e, gates, 0.0), axis=1, keepdims=True)  # column e -> (tm, 1)
        out_ref[...] += g * y


def run_experts(x_bf16, w1, b1, w2, b2, gates, tile_mask, *, tm):
    # x_bf16: (T_pad, D); w1: (E, D, H) bf16; b1: (E, 1, H) f32;
    # w2: (E, H, D) bf16; b2: (E, 1, D) f32; gates: (T_pad, E) f32;
    # tile_mask: (E, n_tiles) int32 (scalar-prefetched into SMEM).
    Tp, D = x_bf16.shape
    E, _, H = w1.shape
    n_tiles = Tp // tm
    cap = _vmem_capacity_bytes()

    def blocks(resident):
        bf, f32 = jnp.bfloat16, jnp.float32
        if resident:
            w = [((E, D, H), bf, 1), ((E, 1, H), f32, 1),
                 ((E, H, D), bf, 1), ((E, 1, D), f32, 1)]
        else:
            w = [((1, D, H), bf, 2), ((1, 1, H), f32, 2),
                 ((1, H, D), bf, 2), ((1, 1, D), f32, 2)]
        return w + [((tm, D), bf, 2),      # x tile
                    ((tm, E), f32, 2),     # gates
                    ((tm, D), f32, 2),     # output
                    ((tm, H), f32, 1),     # hidden activation
                    ((tm, H), bf, 1),      # hidden bf16 copy
                    ((tm, D), f32, 1)]     # y temporary

    # Resident (fetched-once, single-buffered) expert weights when they fit the
    # generation's VMEM; otherwise stream one expert's weights per grid step.
    resident = _sum_block_bytes(blocks(True)) <= cap - (12 << 20)
    vmem_limit = _vmem_limit_bytes(blocks(resident))

    if resident:
        w_specs = [
            _const_block_spec((E, D, H), lambda t, e, m: (0, 0, 0)),
            _const_block_spec((E, 1, H), lambda t, e, m: (0, 0, 0)),
            _const_block_spec((E, H, D), lambda t, e, m: (0, 0, 0)),
            _const_block_spec((E, 1, D), lambda t, e, m: (0, 0, 0)),
        ]
    else:
        # TODO(synk): for very large E*D*H, also make the expert axis the SLOW grid
        # axis (or use a scalar-prefetch grouped matmul) so each expert's weights
        # are DMA'd once instead of once per token tile.
        w_specs = [
            pl.BlockSpec((1, D, H), lambda t, e, m: (e, 0, 0)),
            pl.BlockSpec((1, 1, H), lambda t, e, m: (e, 0, 0)),
            pl.BlockSpec((1, H, D), lambda t, e, m: (e, 0, 0)),
            pl.BlockSpec((1, 1, D), lambda t, e, m: (e, 0, 0)),
        ]

    return pl.pallas_call(
        functools.partial(expert_kernel, resident=resident),
        out_shape=jax.ShapeDtypeStruct((Tp, D), jnp.float32),
        grid_spec=pltpu.PrefetchScalarGridSpec(
            num_scalar_prefetch=1,                      # (E, n_tiles) bitmap -> SMEM
            grid=(n_tiles, E),
            in_specs=[pl.BlockSpec((tm, D), lambda t, e, m: (t, 0))] + w_specs + [
                pl.BlockSpec((tm, E), lambda t, e, m: (t, 0)),   # lane-dense gates, once/tile
            ],
            out_specs=pl.BlockSpec((tm, D), lambda t, e, m: (t, 0)),
        ),
        compiler_params=pltpu.CompilerParams(
            dimension_semantics=("parallel", "arbitrary"),
            vmem_limit_bytes=vmem_limit),
    )(tile_mask, x_bf16, w1, b1, w2, b2, gates)


# ------------------------------ SparseMoE --------------------------------
def init_params(key, n_embed, num_experts):
    hidden = 4 * n_embed
    ks = jax.random.split(key, 8)
    scale = lambda fan_in: 1.0 / jnp.sqrt(fan_in)
    return dict(
        w_route=jax.random.normal(ks[0], (n_embed, num_experts), jnp.float32) * scale(n_embed),
        b_route=jnp.zeros((1, num_experts), jnp.float32),
        w_noise=jax.random.normal(ks[1], (n_embed, num_experts), jnp.float32) * scale(n_embed),
        b_noise=jnp.zeros((1, num_experts), jnp.float32),
        w1=jax.random.normal(ks[2], (num_experts, n_embed, hidden), jnp.float32) * scale(n_embed),
        b1=jax.random.normal(ks[3], (num_experts, 1, hidden), jnp.float32) * 0.01,
        w2=jax.random.normal(ks[4], (num_experts, hidden, n_embed), jnp.float32) * scale(hidden),
        b2=jax.random.normal(ks[5], (num_experts, 1, n_embed), jnp.float32) * 0.01,
    )


@functools.partial(jax.jit, static_argnames=("top_k", "capacity_factor", "token_tile"))
def sparse_moe_forward(params, x, noise_key, *, top_k=2, capacity_factor=1.0,
                       token_tile=512):
    B, S, D = x.shape
    E = params["w_route"].shape[1]
    T = B * S

    # Fixed token tile, decoupled from the problem size, so the grid pipelines
    # (double-buffered DMA) and can shard across TensorCores; pad tokens to a multiple.
    tm = max(8, min(_round_up(token_tile, 8), _round_up(T, 8)))
    T_pad = _round_up(T, tm)
    n_tiles = T_pad // tm

    x_flat = x.reshape(T, D)
    x_pad = jnp.pad(x_flat, ((0, T_pad - T), (0, 0)))           # f32 for the router
    x_bf16 = x_pad.astype(jnp.bfloat16)                          # bf16 for the experts

    # ---- router (Pallas kernel #1): fused (route | noise) projection, f32 math ----
    w_fused = jnp.concatenate([params["w_route"], params["w_noise"]], axis=1)
    b_fused = jnp.concatenate([params["b_route"], params["b_noise"]], axis=1)
    # TODO(synk): generate the Gaussian noise in-kernel (pltpu.prng_seed +
    # pltpu.prng_random_bits) to drop this small HBM stream entirely.
    # NOTE: noise is applied unconditionally (noisy top-k router); gate it on a
    # `training` flag if the reference disables router noise at eval.
    noise = jax.random.normal(noise_key, (T_pad, E), jnp.float32)
    noisy_logits = run_router(x_pad, w_fused, b_fused, noise, tm=tm)[:T]

    # ---- top-k + sparse softmax gates (cheap glue) ----
    topk_logits, indices = jax.lax.top_k(noisy_logits, top_k)              # (T, K)
    topk_w = jax.nn.softmax(topk_logits, axis=-1)                          # == softmax over -inf-scattered logits
    onehot = jax.nn.one_hot(indices, E, dtype=jnp.float32)                 # (T, K, E)
    router_flat = jnp.sum(onehot * topk_w[..., None], axis=1)              # (T, E)

    # ---- capacity limiting: keep only the first `capacity` routed tokens per expert ----
    expert_capacity = max(1, int(T * top_k / E * capacity_factor))         # max(1,..): avoid zeroing all gates
    expert_mask = jnp.any(indices[None, :, :] == jnp.arange(E)[:, None, None], axis=-1)  # (E, T)
    rank = jnp.cumsum(expert_mask.astype(jnp.int32), axis=1)               # 1-indexed rank among selected
    keep = expert_mask & (rank <= expert_capacity)                          # (E, T)
    gates = router_flat * keep.T.astype(jnp.float32)                        # (T, E), lane-dense layout
    gates = jnp.pad(gates, ((0, T_pad - T), (0, 0)))                         # (T_pad, E)

    # ---- per-(tile, expert) "any routed token" bitmap for the in-kernel skip ----
    tile_mask = jnp.any(gates.reshape(n_tiles, tm, E) != 0.0, axis=1)       # (n_tiles, E)
    tile_mask = tile_mask.T.astype(jnp.int32)                                # (E, n_tiles): long axis last (SMEM)

    # ---- experts (Pallas kernel #2): gated dense MLP accumulated over experts ----
    out_flat = run_experts(x_bf16,
                           params["w1"].astype(jnp.bfloat16), params["b1"],
                           params["w2"].astype(jnp.bfloat16), params["b2"],
                           gates, tile_mask, tm=tm)

    final_output = out_flat[:T].reshape(B, S, D)
    entropy_loss = None   # eval mode (Dropout inactive, no aux loss) — matches training=False
    return final_output, entropy_loss


if __name__ == "__main__":
    n_embed = 32
    num_experts = 8
    top_k = 2
    batch, seq = 2, 128     # T = 256 tokens -> two 128-token tiles (pipelining + expert skip)

    key = jax.random.PRNGKey(0)
    k_param, k_x, k_noise = jax.random.split(key, 3)

    params = init_params(k_param, n_embed, num_experts)
    x = jax.random.normal(k_x, (batch, seq, n_embed), jnp.float32)

    out, entropy_loss = sparse_moe_forward(params, x, k_noise,
                                           top_k=top_k, capacity_factor=1.0,
                                           token_tile=128)
    jax.block_until_ready(out)
    assert out.shape == (batch, seq, n_embed)
    assert bool(jnp.all(jnp.isfinite(out)))
    print("KERNEL_OK")
</pallas_src>

<mosaic_0001>
module attributes {stable_mosaic.version = 11 : i64} {
  func.func @router_kernel(%arg0: i32, %arg1: memref<128x32xf32, #tpu.memory_space<vmem>>, %arg2: memref<32x16xf32, #tpu.memory_space<vmem>>, %arg3: memref<1x16xf32, #tpu.memory_space<vmem>>, %arg4: memref<128x8xf32, #tpu.memory_space<vmem>>, %arg5: memref<128x8xf32, #tpu.memory_space<vmem>>) attributes {dimension_semantics = [#tpu.dimension_semantics<parallel>], iteration_bounds = array<i64: 2>, scalar_prefetch = 0 : i64, scratch_operands = 0 : i64, tpu.core_type = #tpu.core_type<tc>, window_params = [{transform_indices = @transform_0, window_bounds = array<i64: 128, 32>}, {pipeline_mode = #tpu.pipeline_mode<synchronous>, transform_indices = @transform_1, window_bounds = array<i64: 32, 16>}, {pipeline_mode = #tpu.pipeline_mode<synchronous>, transform_indices = @transform_2, window_bounds = array<i64: 1, 16>}, {transform_indices = @transform_3, window_bounds = array<i64: 128, 8>}, {transform_indices = @transform_4, window_bounds = array<i64: 128, 8>}]} {
    %c0 = arith.constant 0 : index
    %c0_0 = arith.constant 0 : index
    %0 = vector.load %arg1[%c0, %c0_0] : memref<128x32xf32, #tpu.memory_space<vmem>>, vector<128x32xf32>
    %c0_1 = arith.constant 0 : index
    %c0_2 = arith.constant 0 : index
    %1 = vector.load %arg2[%c0_1, %c0_2] : memref<32x16xf32, #tpu.memory_space<vmem>>, vector<32x16xf32>
    %cst = arith.constant dense<0.000000e+00> : vector<128x16xf32>
    %2 = tpu.matmul %0, %1, %cst {dimension_numbers = #tpu.dot_dimension_numbers<[1], [0], [0], [1], [0, 0, 1, 1], [], []>} : vector<128x32xf32>, vector<32x16xf32>, vector<128x16xf32> -> vector<128x16xf32>
    %c0_3 = arith.constant 0 : index
    %c0_4 = arith.constant 0 : index
    %3 = vector.load %arg3[%c0_3, %c0_4] : memref<1x16xf32, #tpu.memory_space<vmem>>, vector<1x16xf32>
    %4 = vector.broadcast %3 : vector<1x16xf32> to vector<128x16xf32>
    %5 = arith.addf %2, %4 : vector<128x16xf32>
    %6 = vector.extract_strided_slice %5 {offsets = [0, 0], sizes = [128, 8], strides = [1, 1]} : vector<128x16xf32> to vector<128x8xf32>
    %7 = vector.extract_strided_slice %5 {offsets = [0, 8], sizes = [128, 8], strides = [1, 1]} : vector<128x16xf32> to vector<128x8xf32>
    %c0_5 = arith.constant 0 : index
    %c0_6 = arith.constant 0 : index
    %8 = vector.load %arg4[%c0_5, %c0_6] : memref<128x8xf32, #tpu.memory_space<vmem>>, vector<128x8xf32>
    %cst_7 = arith.constant 0.000000e+00 : f32
    %9 = vector.broadcast %cst_7 : f32 to vector<128x8xf32>
    %10 = arith.maximumf %7, %9 : vector<128x8xf32>
    %11 = vector.broadcast %cst_7 : f32 to vector<128x8xf32>
    %12 = arith.subf %7, %11 : vector<128x8xf32>
    %13 = arith.cmpf one, %12, %12 : vector<128x8xf32>
    %14 = vector.broadcast %cst_7 : f32 to vector<128x8xf32>
    %15 = arith.addf %7, %14 : vector<128x8xf32>
    %16 = math.absf %12 : vector<128x8xf32>
    %cst_8 = arith.constant 0.000000e+00 : f32
    %17 = vector.broadcast %cst_8 : f32 to vector<128x8xf32>
    %18 = arith.subf %17, %16 : vector<128x8xf32>
    %19 = math.exp %18 : vector<128x8xf32>
    %20 = math.log1p %19 : vector<128x8xf32>
    %21 = arith.addf %10, %20 : vector<128x8xf32>
    %22 = arith.select %13, %15, %21 : vector<128x8xi1>, vector<128x8xf32>
    %23 = arith.mulf %8, %22 : vector<128x8xf32>
    %24 = arith.addf %6, %23 : vector<128x8xf32>
    %c0_9 = arith.constant 0 : index
    %c0_10 = arith.constant 0 : index
    %25 = vector.load %arg5[%c0_9, %c0_10] : memref<128x8xf32, #tpu.memory_space<vmem>>, vector<128x8xf32>
    tpu.vector_store %arg5[%c0_9, %c0_10], %24 {strides = array<i32>} : memref<128x8xf32, #tpu.memory_space<vmem>>, vector<128x8xf32>,
    return
  }
  func.func @transform_0(%arg0: i32) -> (i32, i32) {
    %c0_i32 = arith.constant 0 : i32
    %c0_i32_0 = arith.constant 0 : i32
    return %arg0, %c0_i32 : i32, i32
  }
  func.func @transform_1(%arg0: i32) -> (i32, i32) {
    %c0_i32 = arith.constant 0 : i32
    %c0_i32_0 = arith.constant 0 : i32
    %c0_i32_1 = arith.constant 0 : i32
    return %c0_i32, %c0_i32_0 : i32, i32
  }
  func.func @transform_2(%arg0: i32) -> (i32, i32) {
    %c0_i32 = arith.constant 0 : i32
    %c0_i32_0 = arith.constant 0 : i32
    %c0_i32_1 = arith.constant 0 : i32
    return %c0_i32, %c0_i32_0 : i32, i32
  }
  func.func @transform_3(%arg0: i32) -> (i32, i32) {
    %c0_i32 = arith.constant 0 : i32
    %c0_i32_0 = arith.constant 0 : i32
    return %arg0, %c0_i32 : i32, i32
  }
  func.func @transform_4(%arg0: i32) -> (i32, i32) {
    %c0_i32 = arith.constant 0 : i32
    %c0_i32_0 = arith.constant 0 : i32
    return %arg0, %c0_i32 : i32, i32
  }
}

module attributes {stable_mosaic.version = 11 : i64} {
  func.func @expert_kernel(%arg0: i32, %arg1: i32, %arg2: memref<8x2xi32, #tpu.memory_space<smem>>, %arg3: memref<128x32xbf16, #tpu.memory_space<vmem>>, %arg4: memref<8x32x128xbf16, #tpu.memory_space<vmem>>, %arg5: memref<8x1x128xf32, #tpu.memory_space<vmem>>, %arg6: memref<8x128x32xbf16, #tpu.memory_space<vmem>>, %arg7: memref<8x1x32xf32, #tpu.memory_space<vmem>>, %arg8: memref<128x8xf32, #tpu.memory_space<vmem>>, %arg9: memref<128x32xf32, #tpu.memory_space<vmem>>) attributes {dimension_semantics = [#tpu.dimension_semantics<parallel>, #tpu.dimension_semantics<arbitrary>], iteration_bounds = array<i64: 2, 8>, scalar_prefetch = 1 : i64, scratch_operands = 0 : i64, tpu.core_type = #tpu.core_type<tc>, window_params = [{transform_indices = @transform_0, window_bounds = array<i64: 128, 32>}, {pipeline_mode = #tpu.pipeline_mode<synchronous>, transform_indices = @transform_1, window_bounds = array<i64: 8, 32, 128>}, {pipeline_mode = #tpu.pipeline_mode<synchronous>, transform_indices = @transform_2, window_bounds = array<i64: 8, 1, 128>}, {pipeline_mode = #tpu.pipeline_mode<synchronous>, transform_indices = @transform_3, window_bounds = array<i64: 8, 128, 32>}, {pipeline_mode = #tpu.pipeline_mode<synchronous>, transform_indices = @transform_4, window_bounds = array<i64: 8, 1, 32>}, {transform_indices = @transform_5, window_bounds = array<i64: 128, 8>}, {transform_indices = @transform_6, window_bounds = array<i64: 128, 32>}]} {
    %c0_i32 = arith.constant 0 : i32
    %0 = arith.cmpi eq, %arg1, %c0_i32 : i32
    %1 = arith.extui %0 : i1 to i32
    %c0_i32_0 = arith.constant 0 : i32
    %2 = arith.cmpi ne, %1, %c0_i32_0 : i32
    scf.if %2 {
      %cst = arith.constant 0.000000e+00 : f32
      %9 = vector.broadcast %cst : f32 to vector<128x32xf32>
      %c0 = arith.constant 0 : index
      %c0_3 = arith.constant 0 : index
      %10 = vector.load %arg9[%c0, %c0_3] : memref<128x32xf32, #tpu.memory_space<vmem>>, vector<128x32xf32>
      tpu.vector_store %arg9[%c0, %c0_3], %9 {strides = array<i32>} : memref<128x32xf32, #tpu.memory_space<vmem>>, vector<128x32xf32>,
    } else {
    }
    %3 = arith.index_cast %arg1 : i32 to index
    %4 = arith.index_cast %arg0 : i32 to index
    %5 = memref.load %arg2[%3, %4] : memref<8x2xi32, #tpu.memory_space<smem>>
    %c0_i32_1 = arith.constant 0 : i32
    %6 = arith.cmpi ne, %5, %c0_i32_1 : i32
    %7 = arith.extui %6 : i1 to i32
    %c0_i32_2 = arith.constant 0 : i32
    %8 = arith.cmpi ne, %7, %c0_i32_2 : i32
    scf.if %8 {
      %c0 = arith.constant 0 : index
      %c0_3 = arith.constant 0 : index
      %9 = vector.load %arg3[%c0, %c0_3] : memref<128x32xbf16, #tpu.memory_space<vmem>>, vector<128x32xbf16>
      %10 = arith.index_cast %arg1 : i32 to index
      %c0_4 = arith.constant 0 : index
      %c0_5 = arith.constant 0 : index
      %11 = vector.load %arg4[%10, %c0_4, %c0_5] : memref<8x32x128xbf16, #tpu.memory_space<vmem>>, vector<1x32x128xbf16>
      %12 = vector.shape_cast %11 : vector<1x32x128xbf16> to vector<32x128xbf16>
      %13 = arith.index_cast %arg1 : i32 to index
      %c0_6 = arith.constant 0 : index
      %c0_7 = arith.constant 0 : index
      %14 = vector.load %arg5[%13, %c0_6, %c0_7] : memref<8x1x128xf32, #tpu.memory_space<vmem>>, vector<1x1x128xf32>
      %15 = vector.shape_cast %14 : vector<1x1x128xf32> to vector<1x128xf32>
      %16 = arith.index_cast %arg1 : i32 to index
      %c0_8 = arith.constant 0 : index
      %c0_9 = arith.constant 0 : index
      %17 = vector.load %arg6[%16, %c0_8, %c0_9] : memref<8x128x32xbf16, #tpu.memory_space<vmem>>, vector<1x128x32xbf16>
      %18 = vector.shape_cast %17 : vector<1x128x32xbf16> to vector<128x32xbf16>
      %19 = arith.index_cast %arg1 : i32 to index
      %c0_10 = arith.constant 0 : index
      %c0_11 = arith.constant 0 : index
      %20 = vector.load %arg7[%19, %c0_10, %c0_11] : memref<8x1x32xf32, #tpu.memory_space<vmem>>, vector<1x1x32xf32>
      %21 = vector.shape_cast %20 : vector<1x1x32xf32> to vector<1x32xf32>
      %cst = arith.constant dense<0.000000e+00> : vector<128x128xf32>
      %22 = tpu.matmul %9, %12, %cst {dimension_numbers = #tpu.dot_dimension_numbers<[1], [0], [0], [1], [0, 0, 1, 1], [], []>} : vector<128x32xbf16>, vector<32x128xbf16>, vector<128x128xf32> -> vector<128x128xf32>
      %23 = vector.broadcast %15 : vector<1x128xf32> to vector<128x128xf32>
      %24 = arith.addf %22, %23 : vector<128x128xf32>
      %cst_12 = arith.constant 0.000000e+00 : f32
      %25 = vector.broadcast %cst_12 : f32 to vector<128x128xf32>
      %26 = arith.maximumf %24, %25 : vector<128x128xf32>
      %27 = arith.truncf %26 : vector<128x128xf32> to vector<128x128xbf16>
      %cst_13 = arith.constant dense<0.000000e+00> : vector<128x32xf32>
      %28 = tpu.matmul %27, %18, %cst_13 {dimension_numbers = #tpu.dot_dimension_numbers<[1], [0], [0], [1], [0, 0, 1, 1], [], []>} : vector<128x128xbf16>, vector<128x32xbf16>, vector<128x32xf32> -> vector<128x32xf32>
      %29 = vector.broadcast %21 : vector<1x32xf32> to vector<128x32xf32>
      %30 = arith.addf %28, %29 : vector<128x32xf32>
      %c0_14 = arith.constant 0 : index
      %c0_15 = arith.constant 0 : index
      %31 = vector.load %arg8[%c0_14, %c0_15] : memref<128x8xf32, #tpu.memory_space<vmem>>, vector<128x8xf32>
      %32 = tpu.iota {dimensions = array<i32: 1>} : vector<128x8xi32>
      %33 = vector.broadcast %arg1 : i32 to vector<128x8xi32>
      %34 = arith.cmpi eq, %32, %33 : vector<128x8xi32>
      %cst_16 = arith.constant 0.000000e+00 : f32
      %35 = vector.broadcast %cst_16 : f32 to vector<128x8xf32>
      %36 = arith.select %34, %31, %35 : vector<128x8xi1>, vector<128x8xf32>
      %cst_17 = arith.constant dense<0.000000e+00> : vector<128xf32>
      %37 = vector.multi_reduction <add>, %36, %cst_17 [1] : vector<128x8xf32> to vector<128xf32>
      %38 = vector.shape_cast %37 : vector<128xf32> to vector<128x1xf32>
      %c0_18 = arith.constant 0 : index
      %c0_19 = arith.constant 0 : index
      %39 = vector.load %arg9[%c0_18, %c0_19] : memref<128x32xf32, #tpu.memory_space<vmem>>, vector<128x32xf32>
      %40 = vector.broadcast %38 : vector<128x1xf32> to vector<128x32xf32>
      %41 = arith.mulf %40, %30 : vector<128x32xf32>
      %42 = arith.addf %39, %41 : vector<128x32xf32>
      %c0_20 = arith.constant 0 : index
      %c0_21 = arith.constant 0 : index
      %43 = vector.load %arg9[%c0_20, %c0_21] : memref<128x32xf32, #tpu.memory_space<vmem>>, vector<128x32xf32>
      tpu.vector_store %arg9[%c0_20, %c0_21], %42 {strides = array<i32>} : memref<128x32xf32, #tpu.memory_space<vmem>>, vector<128x32xf32>,
    } else {
    }
    return
  }
  func.func @transform_0(%arg0: i32, %arg1: i32, %arg2: memref<8x2xi32, #tpu.memory_space<smem>>) -> (i32, i32) {
    %c0_i32 = arith.constant 0 : i32
    %c0_i32_0 = arith.constant 0 : i32
    return %arg0, %c0_i32 : i32, i32
  }
  func.func @transform_1(%arg0: i32, %arg1: i32, %arg2: memref<8x2xi32, #tpu.memory_space<smem>>) -> (i32, i32, i32) {
    %c0_i32 = arith.constant 0 : i32
    %c0_i32_0 = arith.constant 0 : i32
    %c0_i32_1 = arith.constant 0 : i32
    %c0_i32_2 = arith.constant 0 : i32
    return %c0_i32, %c0_i32_0, %c0_i32_1 : i32, i32, i32
  }
  func.func @transform_2(%arg0: i32, %arg1: i32, %arg2: memref<8x2xi32, #tpu.memory_space<smem>>) -> (i32, i32, i32) {
    %c0_i32 = arith.constant 0 : i32
    %c0_i32_0 = arith.constant 0 : i32
    %c0_i32_1 = arith.constant 0 : i32
    %c0_i32_2 = arith.constant 0 : i32
    return %c0_i32, %c0_i32_0, %c0_i32_1 : i32, i32, i32
  }
  func.func @transform_3(%arg0: i32, %arg1: i32, %arg2: memref<8x2xi32, #tpu.memory_space<smem>>) -> (i32, i32, i32) {
    %c0_i32 = arith.constant 0 : i32
    %c0_i32_0 = arith.constant 0 : i32
    %c0_i32_1 = arith.constant 0 : i32
    %c0_i32_2 = arith.constant 0 : i32
    return %c0_i32, %c0_i32_0, %c0_i32_1 : i32, i32, i32
  }
  func.func @transform_4(%arg0: i32, %arg1: i32, %arg2: memref<8x2xi32, #tpu.memory_space<smem>>) -> (i32, i32, i32) {
    %c0_i32 = arith.constant 0 : i32
    %c0_i32_0 = arith.constant 0 : i32
    %c0_i32_1 = arith.constant 0 : i32
    %c0_i32_2 = arith.constant 0 : i32
    return %c0_i32, %c0_i32_0, %c0_i32_1 : i32, i32, i32
  }
  func.func @transform_5(%arg0: i32, %arg1: i32, %arg2: memref<8x2xi32, #tpu.memory_space<smem>>) -> (i32, i32) {
    %c0_i32 = arith.constant 0 : i32
    %c0_i32_0 = arith.constant 0 : i32
    return %arg0, %c0_i32 : i32, i32
  }
  func.func @transform_6(%arg0: i32, %arg1: i32, %arg2: memref<8x2xi32, #tpu.memory_space<smem>>) -> (i32, i32) {
    %c0_i32 = arith.constant 0 : i32
    %c0_i32_0 = arith.constant 0 : i32
    return %arg0, %c0_i32 : i32, i32
  }
}

</mosaic_0001>

<bundles_post_ra>
// kernel: sparse_moe_forward.2
= control target key start
LH: loop header
LB: loop body
LE: loop exit
PB: predicated region body
PF: predicated region fallthrough
CT: control target
= control target key end

     0   :  { %s995_s15 = smov 0   ;;  %s1443_s0 = inlined_call_operand.vmem [shape: f32[256,32], index: 0, kind: input, shape index: {}]   ;;  %s1444_s1 = inlined_call_operand.vmem [shape: f32[32,16], index: 1, kind: input, shape index: {}]   ;;  %s1445_s2 = inlined_call_operand.vmem [shape: f32[1,16], index: 2, kind: input, shape index: {}]   ;;  %s1446_s3 = inlined_call_operand.vmem [shape: f32[256,8], index: 3, kind: input, shape index: {}]   ;;  %s1447_s4 = inlined_call_operand.vmem [shape: f32[256,8], index: 4, kind: output, shape index: {}]  }
   0x1 LB: > { %s846_s16 = sadd.s32 4294967295, %s967_s15   ;;  %p850_p0 = scmp.ge.s32.totalorder %s967_s15, 1  ;;  %s967_s15 = sphi %s995_s15, %s14_s15  }
   0x2   : > { %p174_p1 = scmp.lt.s32.totalorder %s967_s15, 3 }
   0x4   : > { %p175_p2 = pnand %p850_p0, %p174_p1 }
   0x5   : > { %s851_s21 = sshll.u32 (!%p175_p2), %s846_s16, 4  ;;  %s969_s6 = smov (!%p175_p2), 120  }
   0x6   : > { %178 = sbr.rel (%p175_p2) target bundleno = 352 (0x160), region = 36  ;;  %p206_p3 = scmp.lt.s32.totalorder (!%p175_p2), %s851_s21, 31 }
   0xb   : > { %v242_v0 = vld [vmem:[%s1444_s1 + $0x18] sm:$0xff]  ;;  %v241_v1 = vld [vmem:[%s1444_s1 + $0x10] sm:$0xff]  ;;  %v240_v2 = vld [vmem:[%s1444_s1 + $0x8] sm:$0xff]  ;;  %s1465_s21 = smov (!%p206_p3, %s851_s21), 31  ;;  %vm247_vm0 = vcmask 261120  }
   0xc   : > { %308 = vmatpush.msra.mxu0 %v242_v0  ;;  %875 = vmatpush.msra.mxu1 %v242_v0  ;;  %v239_v3 = vld [vmem:[%s1444_s1] sm:$0xff]  ;;  %s1015_s26 = sshll.u32 %s1465_s21, 3 }
   0xd   : > { %876 = vmatpush.msra.mxu2 %v242_v0  ;;  %877 = vmatpush.msra.mxu3 %v242_v0  ;;  %s1021_s29 = scalar_lea.vmem %s1443_s0, %s1015_s26  ;;  %v1058_v20 = vld [vmem:[%s1445_s2] ss:$0 sm:$0xff]  ;;  %s1368_s9 = scalar_lea.vmem %s1446_s3, %s1015_s26 }
   0xe   : > { %309 = vmatpush.msra.mxu0 %v241_v1  ;;  %878 = vmatpush.msra.mxu1 %v241_v1  ;;  %v223_v4 = vld [vmem:[%s1021_s29] sm:$0xff]  ;;  %v224_v8 = vld [vmem:[%s1021_s29 + $0x8] sm:$0xff]  ;;  %v225_v12 = vld [vmem:[%s1021_s29 + $0x10] sm:$0xff]  ;;  %s1375_s12 = scalar_lea.vmem %s1447_s4, %s1015_s26 }
   0xf   : > { %879 = vmatpush.msra.mxu2 %v241_v1  ;;  %880 = vmatpush.msra.mxu3 %v241_v1  ;;  %v227_v5 = vld [vmem:[%s1021_s29 + $0x20] sm:$0xff]  ;;  %v228_v9 = vld [vmem:[%s1021_s29 + $0x28] sm:$0xff]  ;;  %v229_v13 = vld [vmem:[%s1021_s29 + $0x30] sm:$0xff] }
  0x10   : > { %310 = vmatpush.msra.mxu0 %v240_v2  ;;  %881 = vmatpush.msra.mxu1 %v240_v2  ;;  %v231_v6 = vld [vmem:[%s1021_s29 + $0x40] sm:$0xff]  ;;  %v232_v10 = vld [vmem:[%s1021_s29 + $0x48] sm:$0xff]  ;;  %v233_v14 = vld [vmem:[%s1021_s29 + $0x50] sm:$0xff] }
  0x11   : > { %882 = vmatpush.msra.mxu2 %v240_v2  ;;  %883 = vmatpush.msra.mxu3 %v240_v2  ;;  %v235_v7 = vld [vmem:[%s1021_s29 + $0x60] sm:$0xff]  ;;  %v236_v11 = vld [vmem:[%s1021_s29 + $0x68] sm:$0xff]  ;;  %v237_v15 = vld [vmem:[%s1021_s29 + $0x70] sm:$0xff] }
  0x12   : > { %311 = vmatpush.msra.mxu0 %v239_v3  ;;  %884 = vmatpush.msra.mxu1 %v239_v3  ;;  %v226_v16 = vld [vmem:[%s1021_s29 + $0x18] sm:$0xff] }
  0x13   : > { %885 = vmatpush.msra.mxu2 %v239_v3  ;;  %886 = vmatpush.msra.mxu3 %v239_v3  ;;  %v230_v17 = vld [vmem:[%s1021_s29 + $0x38] sm:$0xff] }
  0x14   : > { %857 = vmatmul.msk.f32.vlgmr.msra.gmra.mxu0 %vm247_vm0, %v223_v4  ;;  %861 = vmatmul.msk.f32.vlgmr.msra.gmra.mxu1 %vm247_vm0, %v227_v5  ;;  %v234_v18 = vld [vmem:[%s1021_s29 + $0x58] sm:$0xff] }
  0x15   : > { %865 = vmatmul.msk.f32.vlgmr.msra.gmra.mxu2 %vm247_vm0, %v231_v6  ;;  %869 = vmatmul.msk.f32.vlgmr.msra.gmra.mxu3 %vm247_vm0, %v235_v7  ;;  %v238_v19 = vld [vmem:[%s1021_s29 + $0x78] sm:$0xff] }
  0x1c   : > { %858 = vmatmul.msk.f32.gmra.mxu0 %vm247_vm0, %v224_v8  ;;  %862 = vmatmul.msk.f32.gmra.mxu1 %vm247_vm0, %v228_v9 }
  0x1d   : > { %866 = vmatmul.msk.f32.gmra.mxu2 %vm247_vm0, %v232_v10  ;;  %870 = vmatmul.msk.f32.gmra.mxu3 %vm247_vm0, %v236_v11 }
  0x24   : > { %859 = vmatmul.msk.f32.gmra.mxu0 %vm247_vm0, %v225_v12  ;;  %863 = vmatmul.msk.f32.gmra.mxu1 %vm247_vm0, %v229_v13 }
  0x25   : > { %867 = vmatmul.msk.f32.gmra.mxu2 %vm247_vm0, %v233_v14  ;;  %871 = vmatmul.msk.f32.gmra.mxu3 %vm247_vm0, %v237_v15 }
  0x2c   : > { %860 = vmatmul.msk.f32.gmra.mxu0 %vm247_vm0, %v226_v16  ;;  %864 = vmatmul.msk.f32.gmra.mxu1 %vm247_vm0, %v230_v17 }
  0x2d   : > { %868 = vmatmul.msk.f32.gmra.mxu2 %vm247_vm0, %v234_v18  ;;  %872 = vmatmul.msk.f32.gmra.mxu3 %vm247_vm0, %v238_v19 }
  0x91   : > { %v313_v21 = vpop.f32.mrf.mxu0  ;;  %v325_v22 = vpop.f32.mrf.mxu1 }
  0x92   : > { %v1061_v23 = vadd.f32 %v1058_v20, %v313_v21  ;;  %v1064_v24 = vadd.f32 %v1058_v20, %v325_v22 }
  0x94   : > { %v425_v25 = vand.u32 2147483647, %v1061_v23  ;;  %v429_v26 = vand.u32 2147483647, %v1064_v24  ;;  %v381_v5 = vmax.f32 %v1064_v24, 0.0  ;;  %v377_v8 = vmax.f32 %v1061_v23, 0.0 }
  0x95   : > { %vm397_vm1 = vcmp.ne.f32.partialorder %v1064_v24, %v1064_v24  ;;  %vm393_vm3 = vcmp.ne.f32.partialorder %v1061_v23, %v1061_v23 }
  0x96   : > { %v441_v27 = vsub.f32 0.0, %v425_v25  ;;  %v445_v28 = vsub.f32 0.0, %v429_v26 }
  0x98   : > { %v457_v29 = vmul.f32 1.442695, %v441_v27  ;;  %v465_v30 = vmul.f32 1.442695, %v445_v28  ;;  %v337_v31 = vpop.f32.mrf.mxu2  ;;  %v349_v32 = vpop.f32.mrf.mxu3 }
  0x99   : > { %v1069_v33 = vadd.f32 %v1058_v20, %v337_v31  ;;  %v1072_v34 = vadd.f32 %v1058_v20, %v349_v32  ;;  %v316_v35 = vpop.f32.mrf.mxu0  ;;  %v328_v36 = vpop.f32.mrf.mxu1 }
  0x9a   : > { %897 = vpow2.f32 %v457_v29  ;;  %v1075_v37 = vadd.f32 %v1058_v20, %v316_v35  ;;  %v1080_v40 = vadd.f32 %v1058_v20, %v328_v36 }
  0x9b   : > { %899 = vpow2.f32 %v465_v30  ;;  %v433_v38 = vand.u32 2147483647, %v1069_v33  ;;  %v437_v39 = vand.u32 2147483647, %v1072_v34  ;;  %v385_v16 = vmax.f32 %v1069_v33, 0.0 }
  0x9c   : > { %v426_v41 = vand.u32 2147483647, %v1075_v37  ;;  %v430_v45 = vand.u32 2147483647, %v1080_v40  ;;  %vm401_vm5 = vcmp.ne.f32.partialorder %v1069_v33, %v1069_v33  ;;  %vm405_vm7 = vcmp.ne.f32.partialorder %v1072_v34, %v1072_v34 }
  0x9d   : > { %v449_v42 = vsub.f32 0.0, %v433_v38  ;;  %v453_v43 = vsub.f32 0.0, %v437_v39  ;;  %vm398_vm9 = vcmp.ne.f32.partialorder %v1080_v40, %v1080_v40  ;;  %vm394_vm12 = vcmp.ne.f32.partialorder %v1075_v37, %v1075_v37 }
  0x9e   : > { %v442_v44 = vsub.f32 0.0, %v426_v41  ;;  %v446_v61 = vsub.f32 0.0, %v430_v45 }
  0x9f   : > { %v473_v47 = vmul.f32 1.442695, %v449_v42  ;;  %v481_v51 = vmul.f32 1.442695, %v453_v43 }
  0xa0   : > { %v1084_v46 = vpop.eup %897  ;;  %v340_v48 = vpop.f32.mrf.mxu2  ;;  %v459_v52 = vmul.f32 1.442695, %v442_v44  ;;  %v467_v9 = vmul.f32 1.442695, %v446_v61 }
  0xa1   : > { %v352_v49 = vpop.f32.mrf.mxu3  ;;  %v900_v50 = vpop.eup %899  ;;  %v1087_v53 = vadd.f32 %v1058_v20, %v340_v48  ;;  %v489_v60 = vadd.f32 1.0, %v1084_v46  ;;  %901 = vpow2.f32 %v473_v47  ;;  %v492_v11 = vmul.f32 -0.5, %v1084_v46 }
  0xa2   : > { %v1090_v54 = vadd.f32 %v1058_v20, %v352_v49  ;;  %v319_v55 = vpop.f32.mrf.mxu0  ;;  %v331_v56 = vpop.f32.mrf.mxu1  ;;  %v525_v59 = vadd.f32 1.0, %v900_v50  ;;  %v528_v0 = vmul.f32 -0.5, %v900_v50  ;;  %v531_v3 = vand.u32 2147483647, %v900_v50 }
  0xa3   : > { %v1093_v57 = vadd.f32 %v1058_v20, %v319_v55  ;;  %v1096_v58 = vadd.f32 %v1058_v20, %v331_v56  ;;  %v434_v62 = vand.u32 2147483647, %v1087_v53  ;;  %v493_v25 = vadd.f32 1.0, %v492_v11 }
  0xa4   : > { %v438_v63 = vand.u32 2147483647, %v1090_v54  ;;  %903 = vlog2.f32 %v525_v59  ;;  %v529_v7 = vadd.f32 1.0, %v528_v0  ;;  %vm1108_vm2 = vcmp.lt.f32.partialorder %v531_v3, 0.0004427343 }
  0xa5   : > { %v427_v1 = vand.u32 2147483647, %v1093_v57  ;;  %v431_v2 = vand.u32 2147483647, %v1096_v58  ;;  %v450_v4 = vsub.f32 0.0, %v434_v62  ;;  %905 = vlog2.f32 %v489_v60 }
  0xa6   : > { %v454_v6 = vsub.f32 0.0, %v438_v63  ;;  %907 = vpow2.f32 %v481_v51  ;;  %v530_v29 = vmul.f32 %v900_v50, %v529_v7  ;;  %v495_v30 = vand.u32 2147483647, %v1084_v46 }
  0xa7   : > { %v443_v10 = vsub.f32 0.0, %v427_v1  ;;  %909 = vpow2.f32 %v459_v52  ;;  %v447_v12 = vsub.f32 0.0, %v431_v2  ;;  %v475_v17 = vmul.f32 1.442695, %v450_v4  ;;  %v1121_v26 = vpop.eup %901 }
  0xa8   : > { %v343_v13 = vpop.f32.mrf.mxu2  ;;  %v483_v27 = vmul.f32 1.442695, %v454_v6  ;;  %911 = vpow2.f32 %v467_v9  ;;  %v494_v43 = vmul.f32 %v1084_v46, %v493_v25  ;;  %v561_v49 = vadd.f32 1.0, %v1121_v26 }
  0xa9   : > { %v355_v14 = vpop.f32.mrf.mxu3  ;;  %v1114_v18 = vadd.f32 %v1058_v20, %v343_v13  ;;  %v461_v32 = vmul.f32 1.442695, %v443_v10  ;;  %v469_v39 = vmul.f32 1.442695, %v447_v12  ;;  %913 = vpow2.f32 %v475_v17 }
  0xaa   : > { %v1117_v19 = vadd.f32 %v1058_v20, %v355_v14  ;;  %v322_v21 = vpop.f32.mrf.mxu0  ;;  %v334_v22 = vpop.f32.mrf.mxu1  ;;  %vm496_vm4 = vcmp.lt.f32.partialorder %v495_v30, 0.0004427343  ;;  %v564_v46 = vmul.f32 -0.5, %v1121_v26  ;;  %v389_v7 = vmax.f32 %v1072_v34, 0.0 }
  0xab   : > { %v1124_v28 = vadd.f32 %v1058_v20, %v322_v21  ;;  %v904_v31 = vpop.eup %903  ;;  %v435_v35 = vand.u32 2147483647, %v1114_v18  ;;  %v1130_v41 = vadd.f32 %v1058_v20, %v334_v22  ;;  %915 = vpow2.f32 %v461_v32 }
  0xac   : > { %v439_v36 = vand.u32 2147483647, %v1117_v19  ;;  %v906_v38 = vpop.eup %905  ;;  %v527_v42 = vmul.f32 0.6931472, %v904_v31  ;;  %917 = vlog2.f32 %v561_v49  ;;  %v567_v12 = vand.u32 2147483647, %v1121_v26 }
  0xad   : > { %v1133_v44 = vpop.eup %907  ;;  %v451_v45 = vsub.f32 0.0, %v435_v35  ;;  %v428_v47 = vand.u32 2147483647, %v1124_v28  ;;  %v491_v48 = vmul.f32 0.6931472, %v906_v38  ;;  %919 = vpow2.f32 %v483_v27 }
  0xae   : > { %v1137_v50 = vpop.eup %909  ;;  %v455_v51 = vsub.f32 0.0, %v439_v36  ;;  %v533_v52 = vsel %vm1108_vm2, %v530_v29, %v527_v42  ;;  %v432_v60 = vand.u32 2147483647, %v1130_v41  ;;  %921 = vpow2.f32 %v469_v39 }
  0xaf   : > { %v637_v55 = vadd.f32 %v533_v52, %v381_v5  ;;  %v497_v56 = vsel %vm496_vm4, %v494_v43, %v491_v48  ;;  %v477_v59 = vmul.f32 1.442695, %v451_v45  ;;  %v1143_v0 = vpop.eup %911  ;;  %v444_v1 = vsub.f32 0.0, %v428_v47 }
  0xb0   : > { %v346_v61 = vpop.f32.mrf.mxu2  ;;  %v633_v63 = vadd.f32 %v497_v56, %v377_v8  ;;  %v485_v5 = vmul.f32 1.442695, %v455_v51  ;;  %v565_v8 = vadd.f32 1.0, %v564_v46  ;;  %v597_v9 = vadd.f32 1.0, %v1133_v44  ;;  %v1166_v10 = vpop.eup %913 }
  0xb1   : > { %v358_v62 = vpop.f32.mrf.mxu3  ;;  %v1146_v2 = vadd.f32 %v1058_v20, %v346_v61  ;;  %v653_v4 = vsel %vm397_vm1, %v1064_v24, %v637_v55  ;;  %923 = vpow2.f32 %v477_v59  ;;  %v448_v11 = vsub.f32 0.0, %v432_v60  ;;  %v1170_v14 = vpop.eup %915 }
  0xb2   : > { %v1149_v3 = vadd.f32 %v1058_v20, %v358_v62  ;;  %689 = vrot.lane.b32.xlu2 %v653_v4, %s969_s6  ;;  %v649_v6 = vsel %vm393_vm3, %v1061_v23, %v633_v63  ;;  %v600_v13 = vmul.f32 -0.5, %v1133_v44  ;;  %v463_v15 = vmul.f32 1.442695, %v444_v1  ;;  %v918_v22 = vpop.eup %917 }
  0xb3   : > { %v436_v20 = vand.u32 2147483647, %v1146_v2  ;;  %681 = vrot.lane.b32.xlu0 %v649_v6, %s969_s6  ;;  %925 = vlog2.f32 %v597_v9  ;;  %v534_v27 = vadd.f32 1.0, %v1143_v0  ;;  %v537_v29 = vmul.f32 -0.5, %v1143_v0  ;;  %v1177_v36 = vpop.eup %919 }
  0xb4   : > { %v440_v21 = vand.u32 2147483647, %v1149_v3  ;;  %927 = vpow2.f32 %v485_v5  ;;  %v601_v25 = vadd.f32 1.0, %v600_v13  ;;  %v563_v31 = vmul.f32 0.6931472, %v918_v22  ;;  %v1182_v42 = vpop.eup %921 }
  0xb5   : > { %v452_v17 = vsub.f32 0.0, %v436_v20  ;;  %v566_v32 = vmul.f32 %v1121_v26, %v565_v8  ;;  %v603_v35 = vand.u32 2147483647, %v1133_v44  ;;  %v471_v38 = vmul.f32 1.442695, %v448_v11 }
  0xb6   : > { %vm568_vm6 = vcmp.lt.f32.partialorder %v567_v12, 0.0004427343  ;;  %v382_v39 = vmax.f32 %v1080_v40, 0.0  ;;  %929 = vlog2.f32 %v534_v27  ;;  %v456_v43 = vsub.f32 0.0, %v440_v21 }
  0xb7   : > { %v479_v30 = vmul.f32 1.442695, %v452_v17  ;;  %931 = vpow2.f32 %v463_v15  ;;  %v569_v45 = vsel %vm568_vm6, %v566_v32, %v563_v31  ;;  %v538_v47 = vadd.f32 1.0, %v537_v29  ;;  %v1184_v48 = vpop.eup %923 }
  0xb8   : > { %v641_v26 = vadd.f32 %v569_v45, %v385_v16  ;;  %v602_v49 = vmul.f32 %v1133_v44, %v601_v25  ;;  %v540_v51 = vand.u32 2147483647, %v1143_v0  ;;  %v507_v52 = vadd.f32 1.0, %v1170_v14 }
  0xb9   : > { %v926_v55 = vpop.eup %925  ;;  %933 = vpow2.f32 %v479_v30  ;;  %vm1191_vm8 = vcmp.lt.f32.partialorder %v603_v35, 0.0004427343  ;;  %v510_v46 = vmul.f32 -0.5, %v1170_v14  ;;  %v498_v59 = vadd.f32 1.0, %v1137_v50 }
  0xba   : > { %v1199_v16 = vpop.eup %927  ;;  %v657_v44 = vsel %vm401_vm5, %v1069_v33, %v641_v26  ;;  %v599_v60 = vmul.f32 0.6931472, %v926_v55  ;;  %935 = vlog2.f32 %v507_v52  ;;  %v501_v61 = vmul.f32 -0.5, %v1137_v50 }
  0xbb   : > { %v487_v62 = vmul.f32 1.442695, %v456_v43  ;;  %697 = vrot.lane.b32.xlu2 %v657_v44, %s969_s6  ;;  %v539_v63 = vmul.f32 %v1143_v0, %v538_v47  ;;  %v378_v1 = vmax.f32 %v1075_v37, 0.0  ;;  %937 = vlog2.f32 %v498_v59 }
  0xbc   : > { %v930_v4 = vpop.eup %929  ;;  %v605_v5 = vsel %vm1191_vm8, %v602_v49, %v599_v60  ;;  %vm1211_vm10 = vcmp.lt.f32.partialorder %v540_v51, 0.0004427343  ;;  %v513_v20 = vand.u32 2147483647, %v1170_v14  ;;  %v579_v8 = vadd.f32 1.0, %v1184_v48 }
  0xbd   : > { %v1217_v9 = vpop.eup %931  ;;  %939 = vpow2.f32 %v471_v38  ;;  %v645_v0 = vadd.f32 %v605_v5, %v389_v7  ;;  %v536_v11 = vmul.f32 0.6931472, %v930_v4  ;;  %vm395_vm11 = vcmp.ne.f32.partialorder %v1093_v57, %v1093_v57 }
  0xbe   : > { %v511_v12 = vadd.f32 1.0, %v510_v46  ;;  %v379_v13 = vmax.f32 %v1093_v57, 0.0  ;;  %v502_v15 = vadd.f32 1.0, %v501_v61  ;;  %941 = vlog2.f32 %v579_v8 }
  0xbf   : > { %v582_v17 = vmul.f32 -0.5, %v1184_v48  ;;  %v934_v21 = vpop.eup %933  ;;  %v661_v7 = vsel %vm405_vm7, %v1072_v34, %v645_v0  ;;  %v542_v22 = vsel %vm1211_vm10, %v539_v63, %v536_v11  ;;  %v504_v25 = vand.u32 2147483647, %v1137_v50 }
  0xc0   : > { %v570_v27 = vadd.f32 1.0, %v1166_v10  ;;  %v936_v29 = vpop.eup %935  ;;  %943 = vpow2.f32 %v487_v62  ;;  %705 = vrot.lane.b32.xlu0 %v661_v7, %s969_s6  ;;  %v638_v30 = vadd.f32 %v542_v22, %v382_v39  ;;  %vm1236_vm13 = vcmp.lt.f32.partialorder %v513_v20, 0.0004427343 }
  0xc1   : > { %v573_v32 = vmul.f32 -0.5, %v1166_v10  ;;  %v938_v35 = vpop.eup %937  ;;  %v509_v38 = vmul.f32 0.6931472, %v936_v29  ;;  %v512_v43 = vmul.f32 %v1170_v14, %v511_v12  ;;  %v583_v45 = vadd.f32 1.0, %v582_v17 }
  0xc2   : > { %945 = vlog2.f32 %v570_v27  ;;  %v654_v47 = vsel %vm398_vm9, %v1080_v40, %v638_v30  ;;  %v500_v26 = vmul.f32 0.6931472, %v938_v35  ;;  %v503_v39 = vmul.f32 %v1137_v50, %v502_v15 }
  0xc3   : > { %v585_v49 = vand.u32 2147483647, %v1184_v48  ;;  %v1248_v51 = vpop.eup %939  ;;  %691 = vrot.lane.b32.xlu2 %v654_v47, %s969_s6  ;;  %v515_v52 = vsel %vm1236_vm13, %v512_v43, %v509_v38  ;;  %vm505_vm14 = vcmp.lt.f32.partialorder %v504_v25, 0.0004427343  ;;  %v576_v14 = vand.u32 2147483647, %v1166_v10 }
  0xc4   : > { %v588_v55 = vadd.f32 1.0, %v934_v21  ;;  %v942_v56 = vpop.eup %941  ;;  %v635_v46 = vadd.f32 %v515_v52, %v379_v13  ;;  %v506_v59 = vsel %vm505_vm14, %v503_v39, %v500_v26  ;;  %v574_v44 = vadd.f32 1.0, %v573_v32 }
  0xc5   : > { %v591_v60 = vmul.f32 -0.5, %v934_v21  ;;  %v634_v61 = vadd.f32 %v506_v59, %v378_v1  ;;  %v581_v50 = vmul.f32 0.6931472, %v942_v56  ;;  %v584_v62 = vmul.f32 %v1184_v48, %v583_v45 }
  0xc6   : > { %947 = vlog2.f32 %v588_v55  ;;  %v1255_v63 = vpop.eup %943  ;;  %v651_v4 = vsel %vm395_vm11, %v1093_v57, %v635_v46  ;;  %v387_v5 = vmax.f32 %v1114_v18, 0.0  ;;  %vm586_vm15 = vcmp.lt.f32.partialorder %v585_v49, 0.0004427343 }
  0xc7   : > { %v592_v6 = vadd.f32 1.0, %v591_v60  ;;  %685 = vrot.lane.b32.xlu1 %v651_v4, %s969_s6  ;;  %v650_v48 = vsel %vm394_vm12, %v1075_v37, %v634_v61  ;;  %v587_v1 = vsel %vm586_vm15, %v584_v62, %v581_v50  ;;  %v594_v8 = vand.u32 2147483647, %v934_v21 }
  0xc8   : > { %v946_v20 = vpop.eup %945  ;;  %v516_v0 = vadd.f32 1.0, %v1217_v9  ;;  %683 = vrot.lane.b32.xlu0 %v650_v48, %s969_s6  ;;  %v386_v11 = vmax.f32 %v1087_v53, 0.0  ;;  %v575_v13 = vmul.f32 %v1166_v10, %v574_v44  ;;  %v519_v15 = vmul.f32 -0.5, %v1217_v9 }
  0xc9   : > { %v572_v12 = vmul.f32 0.6931472, %v946_v20  ;;  %v643_v17 = vadd.f32 %v587_v1, %v387_v5  ;;  %vm577_vm0 = vcmp.lt.f32.partialorder %v576_v14, 0.0004427343  ;;  %v388_v7 = vmax.f32 %v1146_v2, 0.0  ;;  %v365_v5 = vld [vmem:[%s1368_s9 + $0x20] sm:$0xff] }
  0xca   : > { %949 = vlog2.f32 %v516_v0  ;;  %v593_v25 = vmul.f32 %v934_v21, %v592_v6  ;;  %v520_v27 = vadd.f32 1.0, %v519_v15  ;;  %v543_v29 = vadd.f32 1.0, %v1182_v42 }
  0xcb   : > { %v578_v22 = vsel %vm577_vm0, %v575_v13, %v572_v12  ;;  %vm1274_vm1 = vcmp.lt.f32.partialorder %v594_v8, 0.0004427343  ;;  %v522_v10 = vand.u32 2147483647, %v1217_v9  ;;  %v546_v35 = vmul.f32 -0.5, %v1182_v42 }
  0xcc   : > { %v948_v30 = vpop.eup %947  ;;  %v642_v31 = vadd.f32 %v578_v22, %v386_v11  ;;  %vm403_vm2 = vcmp.ne.f32.partialorder %v1114_v18, %v1114_v18  ;;  %vm402_vm3 = vcmp.ne.f32.partialorder %v1087_v53, %v1087_v53  ;;  %951 = vlog2.f32 %v543_v29 }
  0xcd   : > { %v590_v21 = vmul.f32 0.6931472, %v948_v30  ;;  %v659_v38 = vsel %vm403_vm2, %v1114_v18, %v643_v17  ;;  %vm404_vm4 = vcmp.ne.f32.partialorder %v1146_v2, %v1146_v2  ;;  %v547_v43 = vadd.f32 1.0, %v546_v35 }
  0xce   : > { %v549_v45 = vand.u32 2147483647, %v1182_v42  ;;  %v521_v26 = vmul.f32 %v1217_v9, %v520_v27  ;;  %v615_v39 = vadd.f32 1.0, %v1199_v16  ;;  %v618_v49 = vmul.f32 -0.5, %v1199_v16 }
  0xcf   : > { %v596_v47 = vsel %vm1274_vm1, %v593_v25, %v590_v21  ;;  %701 = vrot.lane.b32.xlu1 %v659_v38, %s969_s6  ;;  %v658_v14 = vsel %vm402_vm3, %v1087_v53, %v642_v31  ;;  %vm1295_vm5 = vcmp.lt.f32.partialorder %v522_v10, 0.0004427343  ;;  %v380_v46 = vmax.f32 %v1124_v28, 0.0 }
  0xd0   : > { %v950_v52 = vpop.eup %949  ;;  %v644_v55 = vadd.f32 %v596_v47, %v388_v7  ;;  %699 = vrot.lane.b32.xlu0 %v658_v14, %s969_s6  ;;  %v548_v9 = vmul.f32 %v1182_v42, %v547_v43  ;;  %953 = vlog2.f32 %v615_v39  ;;  %v619_v60 = vadd.f32 1.0, %v618_v49 }
  0xd1   : > { %v518_v59 = vmul.f32 0.6931472, %v950_v52  ;;  %v552_v61 = vadd.f32 1.0, %v1248_v51  ;;  %v555_v50 = vmul.f32 -0.5, %v1248_v51  ;;  %vm1311_vm6 = vcmp.lt.f32.partialorder %v549_v45, 0.0004427343 }
  0xd2   : > { %v660_v44 = vsel %vm404_vm4, %v1146_v2, %v644_v55  ;;  %v952_v62 = vpop.eup %951  ;;  %v621_v42 = vand.u32 2147483647, %v1199_v16  ;;  %vm396_vm7 = vcmp.ne.f32.partialorder %v1124_v28, %v1124_v28  ;;  %v383_v48 = vmax.f32 %v1096_v58, 0.0 }
  0xd3   : > { %703 = vrot.lane.b32.xlu2 %v660_v44, %s969_s6  ;;  %v524_v4 = vsel %vm1295_vm5, %v521_v26, %v518_v59  ;;  %v545_v20 = vmul.f32 0.6931472, %v952_v62  ;;  %955 = vlog2.f32 %v552_v61  ;;  %v556_v1 = vadd.f32 1.0, %v555_v50 }
  0xd4   : > { %v636_v6 = vadd.f32 %v524_v4, %v380_v46  ;;  %v624_v8 = vadd.f32 1.0, %v1255_v63  ;;  %v627_v0 = vmul.f32 -0.5, %v1255_v63  ;;  %vm399_vm8 = vcmp.ne.f32.partialorder %v1096_v58, %v1096_v58 }
  0xd5   : > { %v551_v11 = vsel %vm1311_vm6, %v548_v9, %v545_v20  ;;  %v620_v12 = vmul.f32 %v1199_v16, %v619_v60  ;;  %v558_v13 = vand.u32 2147483647, %v1248_v51  ;;  %vm1328_vm9 = vcmp.lt.f32.partialorder %v621_v42, 0.0004427343 }
  0xd6   : > { %v954_v15 = vpop.eup %953  ;;  %v652_v17 = vsel %vm396_vm7, %v1124_v28, %v636_v6  ;;  %v639_v7 = vadd.f32 %v551_v11, %v383_v48  ;;  %957 = vlog2.f32 %v624_v8  ;;  %v628_v27 = vadd.f32 1.0, %v627_v0  ;;  %v369_v48 = vld [vmem:[%s1368_s9 + $0x40] sm:$0xff]  ;;  %v366_v11 = vld [vmem:[%s1368_s9 + $0x28] sm:$0xff] }
  0xd7   : > { %687 = vrot.lane.b32.xlu1 %v652_v17, %s969_s6  ;;  %v617_v25 = vmul.f32 0.6931472, %v954_v15  ;;  %v606_v29 = vadd.f32 1.0, %v1177_v36  ;;  %v609_v30 = vmul.f32 -0.5, %v1177_v36  ;;  %v391_v31 = vmax.f32 %v1117_v19, 0.0 }
  0xd8   : > { %v655_v16 = vsel %vm399_vm8, %v1096_v58, %v639_v7  ;;  %v557_v32 = vmul.f32 %v1248_v51, %v556_v1  ;;  %v630_v10 = vand.u32 2147483647, %v1255_v63  ;;  %vm559_vm10 = vcmp.lt.f32.partialorder %v558_v13, 0.0004427343 }
  0xd9   : > { %v956_v35 = vpop.eup %955  ;;  %693 = vrot.lane.b32.xlu0 %v655_v16, %s969_s6  ;;  %v623_v21 = vsel %vm1328_vm9, %v620_v12, %v617_v25  ;;  %959 = vlog2.f32 %v606_v29  ;;  %v610_v45 = vadd.f32 1.0, %v609_v30  ;;  %vm407_vm11 = vcmp.ne.f32.partialorder %v1117_v19, %v1117_v19  ;;  %v373_v30 = vld [vmem:[%s1368_s9 + $0x60] sm:$0xff] }
  0xda   : > { %v647_v38 = vadd.f32 %v623_v21, %v391_v31  ;;  %v554_v43 = vmul.f32 0.6931472, %v956_v35  ;;  %v384_v47 = vmax.f32 %v1130_v41, 0.0  ;;  %v629_v51 = vmul.f32 %v1255_v63, %v628_v27  ;;  %v362_v21 = vld [vmem:[%s1368_s9 + $0x8] sm:$0xff] }
  0xdb   : > { %v612_v26 = vand.u32 2147483647, %v1177_v36  ;;  %vm631_vm12 = vcmp.lt.f32.partialorder %v630_v10, 0.0004427343  ;;  %vm400_vm13 = vcmp.ne.f32.partialorder %v1130_v41, %v1130_v41  ;;  %v392_v56 = vmax.f32 %v1149_v3, 0.0  ;;  %v363_v10 = vld [vmem:[%s1368_s9 + $0x10] sm:$0xff] }
  0xdc   : > { %v958_v39 = vpop.eup %957  ;;  %v663_v49 = vsel %vm407_vm11, %v1117_v19, %v647_v38  ;;  %v560_v52 = vsel %vm559_vm10, %v557_v32, %v554_v43  ;;  %v611_v46 = vmul.f32 %v1177_v36, %v610_v45  ;;  %vm408_vm15 = vcmp.ne.f32.partialorder %v1149_v3, %v1149_v3  ;;  %v375_v32 = vld [vmem:[%s1368_s9 + $0x70] sm:$0xff] }
  0xdd   : > { %709 = vrot.lane.b32.xlu2 %v663_v49, %s969_s6  ;;  %v640_v14 = vadd.f32 %v560_v52, %v384_v47  ;;  %v626_v55 = vmul.f32 0.6931472, %v958_v39  ;;  %vm613_vm14 = vcmp.lt.f32.partialorder %v612_v26, 0.0004427343  ;;  %v390_v61 = vmax.f32 %v1090_v54, 0.0  ;;  %v371_v26 = vld [vmem:[%s1368_s9 + $0x50] sm:$0xff] }
  0xde   : > { %vm406_vm0 = vcmp.ne.f32.partialorder %v1090_v54, %v1090_v54  ;;  %vm761_vm1 = vcmask 64512   ;;  %v370_v39 = vld [vmem:[%s1368_s9 + $0x48] sm:$0xff] }
  0xdf   : > { %v960_v59 = vpop.eup %959  ;;  %v656_v63 = vsel %vm400_vm13, %v1130_v41, %v640_v14  ;;  %v632_v9 = vsel %vm631_vm12, %v629_v51, %v626_v55 }
  0xe0   : > { %695 = vrot.lane.b32.xlu1 %v656_v63, %s969_s6  ;;  %v648_v44 = vadd.f32 %v632_v9, %v392_v56  ;;  %v608_v60 = vmul.f32 0.6931472, %v960_v59 }
  0xe2   : > { %v664_v50 = vsel %vm408_vm15, %v1149_v3, %v648_v44  ;;  %v614_v62 = vsel %vm613_vm14, %v611_v46, %v608_v60  ;;  %v367_v46 = vld [vmem:[%s1368_s9 + $0x30] sm:$0xff] }
  0xe3   : > { %711 = vrot.lane.b32.xlu0 %v664_v50, %s969_s6  ;;  %v646_v36 = vadd.f32 %v614_v62, %v390_v61  ;;  %v376_v50 = vld [vmem:[%s1368_s9 + $0x78] sm:$0xff] }
  0xe5   : > { %v662_v4 = vsel %vm406_vm0, %v1090_v54, %v646_v36 }
  0xe8   : > { %707 = vrot.lane.b32.xlu1 %v662_v4, %s969_s6 }
 0x10c   : > { %v690_v42 = vpop.permute.xlu2 %689 }
 0x10d   : > { %v733_v6 = vmul.f32 %v690_v42, %v365_v5  ;;  %v374_v5 = vld [vmem:[%s1368_s9 + $0x68] sm:$0xff] }
 0x10f   : > { %v749_v20 = vadd.f32 %v733_v6, %v1064_v24  ;;  %v361_v24 = vld [vmem:[%s1368_s9] sm:$0xff] }
 0x111   : > { %766 = vst.msk [vmem:[%s1375_s12 + $0x20] sm:$0xff] %vm761_vm1, %v749_v20 }
 0x115   : > { %v698_v1 = vpop.permute.xlu2 %697 }
 0x116   : > { %v737_v8 = vmul.f32 %v698_v1, %v369_v48 }
 0x118   : > { %v753_v0 = vadd.f32 %v737_v8, %v1069_v33  ;;  %v372_v33 = vld [vmem:[%s1368_s9 + $0x58] sm:$0xff] }
 0x11a   : > { %770 = vst.msk [vmem:[%s1375_s12 + $0x40] sm:$0xff] %vm761_vm1, %v753_v0 }
 0x11d   : > { %v692_v12 = vpop.permute.xlu2 %691 }
 0x11e   : > { %v734_v13 = vmul.f32 %v692_v12, %v366_v11 }
 0x120   : > { %v750_v15 = vadd.f32 %v734_v13, %v1080_v40 }
 0x122   : > { %767 = vst.msk [vmem:[%s1375_s12 + $0x28] sm:$0xff] %vm761_vm1, %v750_v15 }
 0x125   : > { %v682_v17 = vpop.permute.xlu0 %681 }
 0x126   : > { %v729_v7 = vmul.f32 %v682_v17, %v361_v24 }
 0x128   : > { %v745_v22 = vadd.f32 %v729_v7, %v1061_v23 }
 0x12a   : > { %762 = vst.msk [vmem:[%s1375_s12] sm:$0xff] %vm761_vm1, %v745_v22 }
 0x12d   : > { %v704_v25 = vpop.permute.xlu2 %703 }
 0x12e   : > { %v740_v27 = vmul.f32 %v704_v25, %v372_v33 }
 0x130   : > { %v756_v29 = vadd.f32 %v740_v27, %v1146_v2 }
 0x132   : > { %773 = vst.msk [vmem:[%s1375_s12 + $0x58] sm:$0xff] %vm761_vm1, %v756_v29  ;;  %v706_v40 = vpop.permute.xlu0 %705 }
 0x133   : > { %v741_v16 = vmul.f32 %v706_v40, %v373_v30 }
 0x135   : > { %v757_v31 = vadd.f32 %v741_v16, %v1072_v34 }
 0x137   : > { %774 = vst.msk [vmem:[%s1375_s12 + $0x60] sm:$0xff] %vm761_vm1, %v757_v31  ;;  %v710_v23 = vpop.permute.xlu2 %709 }
 0x138   : > { %v743_v35 = vmul.f32 %v710_v23, %v375_v32 }
 0x139   : > { %v686_v2 = vpop.permute.xlu1 %685 }
 0x13a   : > { %v759_v38 = vadd.f32 %v743_v35, %v1117_v19  ;;  %v731_v43 = vmul.f32 %v686_v2, %v363_v10  ;;  %v684_v45 = vpop.permute.xlu0 %683 }
 0x13b   : > { %v730_v47 = vmul.f32 %v684_v45, %v362_v21 }
 0x13c   : > { %776 = vst.msk [vmem:[%s1375_s12 + $0x70] sm:$0xff] %vm761_vm1, %v759_v38  ;;  %v747_v34 = vadd.f32 %v731_v43, %v1093_v57 }
 0x13d   : > { %v746_v51 = vadd.f32 %v730_v47, %v1075_v37  ;;  %v364_v37 = vld [vmem:[%s1368_s9 + $0x18] sm:$0xff] }
 0x13e   : > { %764 = vst.msk [vmem:[%s1375_s12 + $0x10] sm:$0xff] %vm761_vm1, %v747_v34 }
 0x13f   : > { %763 = vst.msk [vmem:[%s1375_s12 + $0x8] sm:$0xff] %vm761_vm1, %v746_v51 }
 0x141   : > { %v702_v19 = vpop.permute.xlu1 %701 }
 0x142   : > { %v739_v49 = vmul.f32 %v702_v19, %v371_v26  ;;  %v700_v52 = vpop.permute.xlu0 %699 }
 0x143   : > { %v738_v14 = vmul.f32 %v700_v52, %v370_v39 }
 0x144   : > { %v755_v55 = vadd.f32 %v739_v49, %v1114_v18  ;;  %v368_v18 = vld [vmem:[%s1368_s9 + $0x38] sm:$0xff] }
 0x145   : > { %v754_v57 = vadd.f32 %v738_v14, %v1087_v53 }
 0x146   : > { %772 = vst.msk [vmem:[%s1375_s12 + $0x50] sm:$0xff] %vm761_vm1, %v755_v55 }
 0x147   : > { %771 = vst.msk [vmem:[%s1375_s12 + $0x48] sm:$0xff] %vm761_vm1, %v754_v57 }
 0x149   : > { %v688_v56 = vpop.permute.xlu1 %687 }
 0x14a   : > { %v732_v59 = vmul.f32 %v688_v56, %v364_v37 }
 0x14b   : > { %v694_v63 = vpop.permute.xlu0 %693 }
 0x14c   : > { %v748_v9 = vadd.f32 %v732_v59, %v1124_v28  ;;  %v735_v44 = vmul.f32 %v694_v63, %v367_v46 }
 0x14e   : > { %765 = vst.msk [vmem:[%s1375_s12 + $0x18] sm:$0xff] %vm761_vm1, %v748_v9  ;;  %v751_v53 = vadd.f32 %v735_v44, %v1096_v58 }
 0x150   : > { %768 = vst.msk [vmem:[%s1375_s12 + $0x30] sm:$0xff] %vm761_vm1, %v751_v53 }
 0x152   : > { %v696_v60 = vpop.permute.xlu1 %695 }
 0x153   : > { %v736_v61 = vmul.f32 %v696_v60, %v368_v18 }
 0x155   : > { %v752_v62 = vadd.f32 %v736_v61, %v1130_v41  ;;  %v712_v36 = vpop.permute.xlu0 %711 }
 0x156   : > { %v744_v4 = vmul.f32 %v712_v36, %v376_v50 }
 0x157   : > { %769 = vst.msk [vmem:[%s1375_s12 + $0x38] sm:$0xff] %vm761_vm1, %v752_v62 }
 0x158   : > { %v760_v28 = vadd.f32 %v744_v4, %v1149_v3 }
 0x15a   : > { %777 = vst.msk [vmem:[%s1375_s12 + $0x78] sm:$0xff] %vm761_vm1, %v760_v28  ;;  %v708_v42 = vpop.permute.xlu1 %707 }
 0x15b   : > { %v742_v58 = vmul.f32 %v708_v42, %v374_v5 }
 0x15d   : > { %v758_v6 = vadd.f32 %v742_v58, %v1090_v54 }
 0x15f   : > { %775 = vst.msk [vmem:[%s1375_s12 + $0x68] sm:$0xff] %vm761_vm1, %v758_v6 }
 0x160 PF: > { %s14_s15 = sadd.s32 1, %s967_s15  }
 0x161   : > { %p11_p4 = scmp.ge.s32.totalorder %s14_s15, 4  }
 0x163   :  { %13 = sbr.rel (!%p11_p4) target bundleno = 1 (0x1), region = 69 }

// kernel: sparse_moe_forward.3
= control target key start
LH: loop header
LB: loop body
LE: loop exit
PB: predicated region body
PF: predicated region fallthrough
CT: control target
= control target key end

     0   :  { %s1094_s27 = smov [#allocation3]   ;;  %s1445_s0 = inlined_call_operand.vmem [shape: s32[8,2], index: 0, kind: input, shape index: {}]   ;;  %s1446_s1 = inlined_call_operand.vmem [shape: bf16[256,32], index: 1, kind: input, shape index: {}]   ;;  %s1447_s2 = inlined_call_operand.vmem [shape: bf16[8,32,128], index: 2, kind: input, shape index: {}]   ;;  %s1448_s3 = inlined_call_operand.vmem [shape: f32[8,1,128], index: 3, kind: input, shape index: {}]   ;;  %s1449_s4 = inlined_call_operand.vmem [shape: bf16[8,128,32], index: 4, kind: input, shape index: {}]   ;;  %s1450_s5 = inlined_call_operand.vmem [shape: f32[8,1,32], index: 5, kind: input, shape index: {}]   ;;  %s1451_s6 = inlined_call_operand.vmem [shape: f32[256,8], index: 6, kind: input, shape index: {}]   ;;  %s1452_s7 = inlined_call_operand.vmem [shape: f32[256,32], index: 7, kind: output, shape index: {}]  }
   0x1   :  { %s13_s26 = sshll.u32 %s1445_s0, 4  ;;  %s14_s26 = int_to_ptr.vmem [resolvable:$true] %s13_s26 }
   0x2   :  { %16 = dma.vmem_to_smem %s14_s26, 128, %s1094_s27, [#allocation2] }
   0x3   :  { %1072 = dma.done.wait [#allocation2], 128 }
   0x4   :  { %1073 = vsyncadd [#allocation2], 4294967168 }
   0x5   :  { %19 = sfence }
   0x6   :  { %s1139_s28 = smov 0   ;;  %s1141_s29 = smov 0  }
   0x7   :  { %s1143_s30 = smov 0   ;;  %s1145_s8 = smov 0  }
   0x8   :  { %s1147_s9 = smov 0  }
   0x9 LB: > { %s34_s0 = sadd.s32 1, %s1084_s30  ;;  %s37_s10 = sadd.s32 1, %s1088_s8  ;;  %s1092_s9 = sphi %s1147_s9, %s25_s9   ;;  %s1088_s8 = sphi %s1145_s8, %s1458_s8   ;;  %s1084_s30 = sphi %s1143_s30, %s1457_s30   ;;  %s1080_s29 = sphi %s1141_s29, %s1456_s29   ;;  %s1076_s28 = sphi %s1139_s28, %s1455_s28  }
   0xa   : > { %p35_p0 = scmp.ge.s32.totalorder %s34_s0, 8  ;;  %p870_p1 = scmp.ge.s32.totalorder %s1092_s9, 1 }
   0xb   : > { %p245_p2 = scmp.lt.s32.totalorder %s1092_s9, 17 }
   0xc   : > { %s1460_s0 = smov (%p35_p0, %s34_s0), 0  ;;  %s1462_s10 = smov (!%p35_p0, %s37_s10), %s1088_s8 }
   0xd   : > { %p246_p3 = pnand %p870_p1, %p245_p2  ;;  %p39_p4 = scmp.ge.s32.totalorder %s1462_s10, 2 }
   0xe   : > { %s871_s11 = sshll.u32 (!%p246_p3), %s1080_s29, 4  ;;  %p877_p6 = scmp.ne.s32.totalorder (!%p246_p3), %s1076_s28, 0 }
   0xf   : > { %s1464_s10 = smov (%p39_p4, %s1462_s10), 0  ;;  %249 = sbr.rel (%p246_p3) target bundleno = 466 (0x1d2), region = 44 }
  0x10   : > { %p281_p5 = scmp.lt.s32.totalorder (!%p246_p3), %s871_s11, 31 }
  0x14   : > { %s1466_s11 = smov (!%p281_p5, %s871_s11), 31  ;;  %302 = sbr.rel (%p877_p6) target bundleno = 42 (0x2a), region = 48 }
  0x15   : > { %s872_s12 = sshll.u32 %s1466_s11, 2  ;;  %s874_s13 = sshll.u32 %s1466_s11, 3 }
  0x16   : > { %s1177_s16 = scalar_lea.vmem %s1446_s1, %s872_s12  ;;  %s1182_s19 = scalar_lea.vmem %s1451_s6, %s874_s13 }
  0x17   : > { %s1187_s22 = scalar_lea.vmem %s1452_s7, %s874_s13 }
  0x19   : > { %vm303_vm0 = vcmask 261120   ;;  %v1095_v0 = vmov 0.0  }
  0x1a   : > { %304 = vst.msk [vmem:[%s1187_s22] sm:$0xff] %vm303_vm0, %v1095_v0 }
  0x1b   : > { %305 = vst.msk [vmem:[%s1187_s22 + $0x8] sm:$0xff] %vm303_vm0, %v1095_v0 }
  0x1c   : > { %306 = vst.msk [vmem:[%s1187_s22 + $0x10] sm:$0xff] %vm303_vm0, %v1095_v0 }
  0x1d   : > { %307 = vst.msk [vmem:[%s1187_s22 + $0x18] sm:$0xff] %vm303_vm0, %v1095_v0 }
  0x1e   : > { %308 = vst.msk [vmem:[%s1187_s22 + $0x20] sm:$0xff] %vm303_vm0, %v1095_v0 }
  0x1f   : > { %309 = vst.msk [vmem:[%s1187_s22 + $0x28] sm:$0xff] %vm303_vm0, %v1095_v0 }
  0x20   : > { %310 = vst.msk [vmem:[%s1187_s22 + $0x30] sm:$0xff] %vm303_vm0, %v1095_v0 }
  0x21   : > { %311 = vst.msk [vmem:[%s1187_s22 + $0x38] sm:$0xff] %vm303_vm0, %v1095_v0 }
  0x22   : > { %312 = vst.msk [vmem:[%s1187_s22 + $0x40] sm:$0xff] %vm303_vm0, %v1095_v0 }
  0x23   : > { %313 = vst.msk [vmem:[%s1187_s22 + $0x48] sm:$0xff] %vm303_vm0, %v1095_v0 }
  0x24   : > { %314 = vst.msk [vmem:[%s1187_s22 + $0x50] sm:$0xff] %vm303_vm0, %v1095_v0 }
  0x25   : > { %315 = vst.msk [vmem:[%s1187_s22 + $0x58] sm:$0xff] %vm303_vm0, %v1095_v0 }
  0x26   : > { %316 = vst.msk [vmem:[%s1187_s22 + $0x60] sm:$0xff] %vm303_vm0, %v1095_v0 }
  0x27   : > { %317 = vst.msk [vmem:[%s1187_s22 + $0x68] sm:$0xff] %vm303_vm0, %v1095_v0 }
  0x28   : > { %318 = vst.msk [vmem:[%s1187_s22 + $0x70] sm:$0xff] %vm303_vm0, %v1095_v0 }
  0x29   : > { %319 = vst.msk [vmem:[%s1187_s22 + $0x78] sm:$0xff] %vm303_vm0, %v1095_v0 }
  0x2a PF: > { %s320_s23 = sshra.s32 %s1080_s29, 7  ;;  %s325_s24 = sand.u32 127, %s1080_s29 }
  0x2b   : > { %s322_s25 = sadd.s32 %s1076_s28, %s320_s23 }
  0x2c   : > { %s878_s26 = sshll.u32 %s322_s25, 7 }
  0x2d   : > { %s326_s27 = sadd.s32 %s878_s26, %s325_s24 }
  0x2e   : > { %s327_s11 = sld [smem:[#allocation3 + %s326_s27]] }
  0x34   : > { %p879_p7 = scmp.eq.s32.totalorder %s327_s11, 0 }
  0x35   : > { %s974_s12 = sshll.u32 (!%p879_p7), %s1076_s28, 4  ;;  %s355_s18 = scalar_lea.vmem (!%p879_p7), %s1448_s3, %s1076_s28 }
  0x36   : > { %331 = sbr.rel (%p879_p7) target bundleno = 466 (0x1d2), region = 52  ;;  %s350_s15 = scalar_lea.vmem (!%p879_p7), %s1447_s2, %s974_s12 }
  0x37   : > { %s977_s20 = sshll.u32 (!%p879_p7), %s1076_s28, 6  ;;  %s376_s26 = scalar_lea.vmem (!%p879_p7), %s1450_s5, %s1076_s28 }
  0x38   : > { %s1242_s24 = scalar_lea.vmem (!%p879_p7), %s1449_s4, %s977_s20 }
  0x3b   : > { %v976_v1 = vld [vmem:[%s350_s15 + $0x8] sm:$0xff]  ;;  %v975_v2 = vld [vmem:[%s350_s15] sm:$0xff]  ;;  %vm433_vm1 = vcmask 261120   ;;  %v968_v5 = vld [vmem:[%s1177_s16 + $0x10] sm:$0xff]  ;;  %v647_v19 = vlaneseq  ;;  %v649_v21 = vstv %s1076_s28  ;;  %vm667_vm3 = vcmask 64512  }
  0x3c   : > { %464 = vmatpush.bf16.msra.mxu0 %v976_v1  ;;  %986 = vmatpush.bf16.msra.mxu3 %v976_v1  ;;  %v966_v3 = vld [vmem:[%s1177_s16] sm:$0xff]  ;;  %v967_v4 = vld [vmem:[%s1177_s16 + $0x8] sm:$0xff]  ;;  %v985_v7 = vld [vmem:[%s1242_s24 + $0x38] sm:$0xff] }
  0x3d   : > { %v971_v6 = vld [vmem:[%s1177_s16 + $0x28] sm:$0xff]  ;;  %582 = vmatpush.bf16.msra.mxu1 %v985_v7  ;;  %v984_v8 = vld [vmem:[%s1242_s24 + $0x30] sm:$0xff]  ;;  %988 = vmatpush.bf16.msra.mxu2 %v985_v7  ;;  %v969_v10 = vld [vmem:[%s1177_s16 + $0x18] sm:$0xff]  ;;  %v648_v20 = vand.u32 127, %v647_v19 }
  0x3e   : > { %v983_v9 = vld [vmem:[%s1242_s24 + $0x28] sm:$0xff]  ;;  %v982_v11 = vld [vmem:[%s1242_s24 + $0x20] sm:$0xff]  ;;  %v972_v12 = vld [vmem:[%s1177_s16 + $0x30] sm:$0xff] }
  0x3f   : > { %v970_v13 = vld [vmem:[%s1177_s16 + $0x20] sm:$0xff]  ;;  %v973_v14 = vld [vmem:[%s1177_s16 + $0x38] sm:$0xff]  ;;  %v980_v16 = vld [vmem:[%s1242_s24 + $0x10] sm:$0xff]  ;;  %vm1265_vm2 = vcmp.eq.s32.totalorder %v648_v20, %v649_v21 }
  0x40   : > { %465 = vmatpush.bf16.msra.mxu0 %v975_v2  ;;  %987 = vmatpush.bf16.msra.mxu3 %v975_v2  ;;  %v981_v15 = vld [vmem:[%s1242_s24 + $0x18] sm:$0xff]  ;;  %v979_v17 = vld [vmem:[%s1242_s24 + $0x8] sm:$0xff]  ;;  %v978_v18 = vld [vmem:[%s1242_s24] sm:$0xff] }
  0x41   : > { %583 = vmatpush.bf16.msra.mxu1 %v984_v8  ;;  %989 = vmatpush.bf16.msra.mxu2 %v984_v8  ;;  %v631_v22 = vld [vmem:[%s1182_s19] sm:$0xff]  ;;  %v632_v27 = vld [vmem:[%s1182_s19 + $0x8] sm:$0xff]  ;;  %v633_v33 = vld [vmem:[%s1182_s19 + $0x10] sm:$0xff] }
  0x42   : > { %v651_v24 = vsel %vm1265_vm2, %v631_v22, 0.0  ;;  %v652_v28 = vsel %vm1265_vm2, %v632_v27, 0.0  ;;  %v1285_v30 = vld [vmem:[%s355_s18] ss:$0 sm:$0xff]  ;;  %v653_v35 = vsel %vm1265_vm2, %v633_v33, 0.0  ;;  %v634_v41 = vld [vmem:[%s1182_s19 + $0x18] sm:$0xff] }
  0x43   : > { %924 = vmatmul.msk.bf16.vlgmr.msra.gmra.mxu0 %vm433_vm1, %v966_v3  ;;  %929 = vmatmul.msk.bf16.vlgmr.msra.gmra.mxu3 %vm433_vm1, %v971_v6  ;;  %v668_v25 = vsel %vm667_vm3, %v651_v24, 0.0  ;;  %v671_v29 = vsel %vm667_vm3, %v652_v28, 0.0  ;;  %v674_v36 = vsel %vm667_vm3, %v653_v35, 0.0  ;;  %v654_v42 = vsel %vm1265_vm2, %v634_v41, 0.0  ;;  %v635_v46 = vld [vmem:[%s1182_s19 + $0x20] sm:$0xff]  ;;  %v636_v54 = vld [vmem:[%s1182_s19 + $0x28] sm:$0xff] }
  0x44   : > { %669 = vadd.xlane.f32.xlu0 %v668_v25  ;;  %675 = vadd.xlane.f32.xlu1 %v674_v36  ;;  %v677_v43 = vsel %vm667_vm3, %v654_v42, 0.0  ;;  %v655_v48 = vsel %vm1265_vm2, %v635_v46, 0.0  ;;  %v656_v55 = vsel %vm1265_vm2, %v636_v54, 0.0  ;;  %v637_v59 = vld [vmem:[%s1182_s19 + $0x30] sm:$0xff]  ;;  %v638_v2 = vld [vmem:[%s1182_s19 + $0x38] sm:$0xff]  ;;  %v643_v42 = vld [vmem:[%s1182_s19 + $0x60] sm:$0xff] }
  0x45   : > { %584 = vmatpush.bf16.msra.mxu1 %v983_v9  ;;  %990 = vmatpush.bf16.msra.mxu2 %v983_v9  ;;  %v680_v49 = vsel %vm667_vm3, %v655_v48, 0.0  ;;  %v683_v56 = vsel %vm667_vm3, %v656_v55, 0.0  ;;  %v657_v61 = vsel %vm1265_vm2, %v637_v59, 0.0  ;;  %v641_v28 = vld [vmem:[%s1182_s19 + $0x50] sm:$0xff] }
  0x46   : > { %681 = vadd.xlane.f32.xlu2 %v680_v49  ;;  %v686_v62 = vsel %vm667_vm3, %v657_v61, 0.0  ;;  %v645_v54 = vld [vmem:[%s1182_s19 + $0x70] sm:$0xff] }
  0x47   : > { %v665_v55 = vsel %vm1265_vm2, %v645_v54, 0.0  ;;  %v724_v54 = vld [vmem:[%s1187_s22 + $0x40] sm:$0xff] }
  0x49   : > { %585 = vmatpush.bf16.msra.mxu1 %v982_v11  ;;  %991 = vmatpush.bf16.msra.mxu2 %v982_v11 }
  0x4c   : > { %672 = vadd.xlane.f32.xlu0 %v671_v29  ;;  %678 = vadd.xlane.f32.xlu1 %v677_v43  ;;  %v661_v29 = vsel %vm1265_vm2, %v641_v28, 0.0  ;;  %v663_v43 = vsel %vm1265_vm2, %v643_v42, 0.0  ;;  %v722_v42 = vld [vmem:[%s1187_s22 + $0x30] sm:$0xff] }
  0x4d   : > { %586 = vmatpush.bf16.msra.mxu1 %v981_v15  ;;  %992 = vmatpush.bf16.msra.mxu2 %v981_v15 }
  0x4e   : > { %684 = vadd.xlane.f32.xlu2 %v683_v56  ;;  %v710_v56 = vsel %vm667_vm3, %v665_v55, 0.0 }
  0x51   : > { %587 = vmatpush.bf16.msra.mxu1 %v980_v16  ;;  %993 = vmatpush.bf16.msra.mxu2 %v980_v16 }
  0x53   : > { %925 = vmatmul.msk.bf16.gmra.mxu0 %vm433_vm1, %v967_v4  ;;  %930 = vmatmul.msk.bf16.gmra.mxu3 %vm433_vm1, %v972_v12  ;;  %v658_v4 = vsel %vm1265_vm2, %v638_v2, 0.0  ;;  %v639_v12 = vld [vmem:[%s1182_s19 + $0x40] sm:$0xff] }
  0x54   : > { %687 = vadd.xlane.f32.xlu0 %v686_v62  ;;  %v1364_v2 = vld [vmem:[%s376_s26] ss:$0 sm:$0xff] }
  0x55   : > { %588 = vmatpush.bf16.msra.mxu1 %v979_v17  ;;  %994 = vmatpush.bf16.msra.mxu2 %v979_v17 }
  0x59   : > { %589 = vmatpush.bf16.msra.mxu1 %v978_v18  ;;  %995 = vmatpush.bf16.msra.mxu2 %v978_v18 }
  0x63   : > { %926 = vmatmul.msk.bf16.gmra.mxu0 %vm433_vm1, %v968_v5  ;;  %931 = vmatmul.msk.bf16.gmra.mxu3 %vm433_vm1, %v973_v14  ;;  %v689_v5 = vsel %vm667_vm3, %v658_v4, 0.0  ;;  %v640_v14 = vld [vmem:[%s1182_s19 + $0x48] sm:$0xff]  ;;  %v716_v4 = vld [vmem:[%s1187_s22] sm:$0xff] }
  0x64   : > { %690 = vadd.xlane.f32.xlu1 %v689_v5  ;;  %v660_v18 = vsel %vm1265_vm2, %v640_v14, 0.0 }
  0x65   : > { %v695_v19 = vsel %vm667_vm3, %v660_v18, 0.0 }
  0x66   : > { %696 = vadd.xlane.f32.xlu0 %v695_v19 }
  0x73   : > { %927 = vmatmul.msk.bf16.gmra.mxu0 %vm433_vm1, %v969_v10 }
  0x83   : > { %928 = vmatmul.msk.bf16.gmra.mxu0 %vm433_vm1, %v970_v13  ;;  %v659_v13 = vsel %vm1265_vm2, %v639_v12, 0.0 }
  0x84   : > { %v692_v17 = vsel %vm667_vm3, %v659_v13, 0.0 }
  0x85   : > { %693 = vadd.xlane.f32.xlu2 %v692_v17 }
  0xb7   : > { %v676_v13 = vpop.xlane.xlu1 %675 }
  0xc0   : > { %v467_v26 = vpop.f32.mrf.mxu0 }
  0xc1   : > { %v468_v31 = vadd.f32 %v1285_v30, %v467_v26 }
  0xc3   : > { %v507_v37 = vmax.f32 %v468_v31, 0.0  ;;  %v642_v31 = vld [vmem:[%s1182_s19 + $0x58] sm:$0xff] }
  0xc4   : > { %v662_v33 = vsel %vm1265_vm2, %v642_v31, 0.0 }
  0xc6   : > { %v492_v16 = vpop.f32.mrf.mxu3 }
  0xc7   : > { %v493_v36 = vadd.f32 %v1285_v30, %v492_v16  ;;  %v718_v16 = vld [vmem:[%s1187_s22 + $0x10] sm:$0xff] }
  0xc8   : > { %v469_v32 = vpop.f32.mrf.mxu0 }
  0xc9   : > { %v470_v34 = vadd.f32 %v1285_v30, %v469_v32  ;;  %v698_v32 = vsel %vm667_vm3, %v661_v29, 0.0  ;;  %v720_v29 = vld [vmem:[%s1187_s22 + $0x20] sm:$0xff] }
  0xca   : > { %699 = vadd.xlane.f32.xlu1 %v698_v32 }
  0xcb   : > { %v508_v38 = vmax.f32 %v470_v34, 0.0  ;;  %v701_v34 = vsel %vm667_vm3, %v662_v33, 0.0 }
  0xcc   : > { %702 = vadd.xlane.f32.xlu2 %v701_v34 }
  0xcd   : > { %v523_v39 = vpack.c.bf16 %v508_v38, %v507_v37  ;;  %v517_v38 = vmax.f32 %v493_v36, 0.0  ;;  %v721_v36 = vld [vmem:[%s1187_s22 + $0x28] sm:$0xff] }
  0xce   : > { %v494_v24 = vpop.f32.mrf.mxu3 }
  0xcf   : > { %590 = vmatmul.bf16.vlgmr.msra.gmra.mxu1 %v523_v39  ;;  %v495_v37 = vadd.f32 %v1285_v30, %v494_v24 }
  0xd0   : > { %v472_v40 = vpop.f32.mrf.mxu0 }
  0xd1   : > { %v473_v44 = vadd.f32 %v1285_v30, %v472_v40  ;;  %v518_v39 = vmax.f32 %v495_v37, 0.0 }
  0xd3   : > { %v509_v50 = vmax.f32 %v473_v44, 0.0  ;;  %v528_v40 = vpack.c.bf16 %v518_v39, %v517_v38  ;;  %v644_v44 = vld [vmem:[%s1182_s19 + $0x68] sm:$0xff] }
  0xd4   : > { %v664_v46 = vsel %vm1265_vm2, %v644_v44, 0.0  ;;  %711 = vadd.xlane.f32.xlu2 %v710_v56 }
  0xd6   : > { %v497_v35 = vpop.f32.mrf.mxu3 }
  0xd7   : > { %v498_v48 = vadd.f32 %v1285_v30, %v497_v35 }
  0xd8   : > { %v474_v45 = vpop.f32.mrf.mxu0 }
  0xd9   : > { %v475_v47 = vadd.f32 %v1285_v30, %v474_v45  ;;  %v704_v45 = vsel %vm667_vm3, %v663_v43, 0.0 }
  0xda   : > { %705 = vadd.xlane.f32.xlu0 %v704_v45 }
  0xdb   : > { %v510_v51 = vmax.f32 %v475_v47, 0.0  ;;  %v707_v47 = vsel %vm667_vm3, %v664_v46, 0.0 }
  0xdc   : > { %708 = vadd.xlane.f32.xlu1 %v707_v47 }
  0xdd   : > { %v524_v52 = vpack.c.bf16 %v510_v51, %v509_v50  ;;  %v519_v51 = vmax.f32 %v498_v48, 0.0  ;;  %v723_v48 = vld [vmem:[%s1187_s22 + $0x38] sm:$0xff] }
  0xde   : > { %v499_v41 = vpop.f32.mrf.mxu3 }
  0xdf   : > { %595 = vmatmul.bf16.gmra.mxu1 %v524_v52  ;;  %v500_v49 = vadd.f32 %v1285_v30, %v499_v41 }
  0xe0   : > { %v477_v53 = vpop.f32.mrf.mxu0 }
  0xe1   : > { %v478_v57 = vadd.f32 %v1285_v30, %v477_v53  ;;  %v520_v52 = vmax.f32 %v500_v49, 0.0 }
  0xe3   : > { %v511_v63 = vmax.f32 %v478_v57, 0.0  ;;  %v529_v53 = vpack.c.bf16 %v520_v52, %v519_v51 }
  0xe6   : > { %v502_v50 = vpop.f32.mrf.mxu3 }
  0xe8   : > { %v479_v58 = vpop.f32.mrf.mxu0 }
  0xe9   : > { %v480_v60 = vadd.f32 %v1285_v30, %v479_v58  ;;  %v503_v58 = vadd.f32 %v1285_v30, %v502_v50 }
  0xeb   : > { %v512_v0 = vmax.f32 %v480_v60, 0.0  ;;  %v646_v60 = vld [vmem:[%s1182_s19 + $0x78] sm:$0xff] }
  0xec   : > { %v666_v61 = vsel %vm1265_vm2, %v646_v60, 0.0  ;;  %v725_v60 = vld [vmem:[%s1187_s22 + $0x48] sm:$0xff] }
  0xed   : > { %v525_v1 = vpack.c.bf16 %v512_v0, %v511_v63  ;;  %v713_v62 = vsel %vm667_vm3, %v666_v61, 0.0  ;;  %v521_v63 = vmax.f32 %v503_v58, 0.0 }
  0xee   : > { %v504_v57 = vpop.f32.mrf.mxu3  ;;  %714 = vadd.xlane.f32.xlu0 %v713_v62 }
  0xef   : > { %600 = vmatmul.bf16.gmra.mxu1 %v525_v1  ;;  %v505_v59 = vadd.f32 %v1285_v30, %v504_v57 }
  0xf0   : > { %v482_v3 = vpop.f32.mrf.mxu0 }
  0xf1   : > { %v483_v6 = vadd.f32 %v1285_v30, %v482_v3  ;;  %v522_v0 = vmax.f32 %v505_v59, 0.0 }
  0xf3   : > { %v513_v9 = vmax.f32 %v483_v6, 0.0  ;;  %v530_v1 = vpack.c.bf16 %v522_v0, %v521_v63 }
  0xf8   : > { %v484_v7 = vpop.f32.mrf.mxu0 }
  0xf9   : > { %v485_v8 = vadd.f32 %v1285_v30, %v484_v7 }
  0xfb   : > { %v514_v10 = vmax.f32 %v485_v8, 0.0 }
  0xfd   : > { %v526_v11 = vpack.c.bf16 %v514_v10, %v513_v9  ;;  %v717_v10 = vld [vmem:[%s1187_s22 + $0x8] sm:$0xff] }
  0xff   : > { %605 = vmatmul.bf16.gmra.mxu1 %v526_v11 }
 0x100   : > { %v487_v15 = vpop.f32.mrf.mxu0 }
 0x101   : > { %v488_v20 = vadd.f32 %v1285_v30, %v487_v15 }
 0x103   : > { %v515_v25 = vmax.f32 %v488_v20, 0.0  ;;  %v679_v20 = vpop.xlane.xlu1 %678 }
 0x108   : > { %v489_v21 = vpop.f32.mrf.mxu0 }
 0x109   : > { %v490_v22 = vadd.f32 %v1285_v30, %v489_v21  ;;  %v670_v30 = vpop.xlane.xlu0 %669 }
 0x10b   : > { %v516_v26 = vmax.f32 %v490_v22, 0.0  ;;  %v719_v22 = vld [vmem:[%s1187_s22 + $0x18] sm:$0xff]  ;;  %v691_v46 = vpop.xlane.xlu1 %690 }
 0x10d   : > { %v527_v27 = vpack.c.bf16 %v516_v26, %v515_v25  ;;  %v682_v26 = vpop.xlane.xlu2 %681 }
 0x10f   : > { %610 = vmatmul.bf16.vlgmr.msra.gmra.mxu2 %v527_v27 }
 0x111   : > { %v673_v8 = vpop.xlane.xlu0 %672 }
 0x115   : > { %v685_v34 = vpop.xlane.xlu2 %684 }
 0x11d   : > { %v694_v52 = vpop.xlane.xlu2 %693 }
 0x11f   : > { %615 = vmatmul.bf16.gmra.mxu2 %v528_v40  ;;  %v688_v40 = vpop.xlane.xlu0 %687 }
 0x127   : > { %v697_v58 = vpop.xlane.xlu0 %696 }
 0x12f   : > { %620 = vmatmul.bf16.gmra.mxu2 %v529_v53 }
 0x13d   : > { %v700_v0 = vpop.xlane.xlu1 %699 }
 0x13f   : > { %625 = vmatmul.bf16.gmra.mxu2 %v530_v1 }
 0x14c   : > { %v591_v3 = vpop.f32.mrf.mxu1 }
 0x14d   : > { %v592_v23 = vadd.f32 %v1364_v2, %v591_v3 }
 0x14f   : > { %v732_v5 = vmul.f32 %v670_v30, %v592_v23  ;;  %v726_v30 = vld [vmem:[%s1187_s22 + $0x50] sm:$0xff] }
 0x151   : > { %v748_v6 = vadd.f32 %v732_v5, %v716_v4  ;;  %v703_v5 = vpop.xlane.xlu2 %702 }
 0x153   : > { %764 = vst.msk [vmem:[%s1187_s22] sm:$0xff] %vm433_vm1, %v748_v6 }
 0x154   : > { %v593_v7 = vpop.f32.mrf.mxu1 }
 0x155   : > { %v594_v9 = vadd.f32 %v1364_v2, %v593_v7  ;;  %v727_v7 = vld [vmem:[%s1187_s22 + $0x58] sm:$0xff] }
 0x157   : > { %v733_v11 = vmul.f32 %v673_v8, %v594_v9 }
 0x159   : > { %v749_v12 = vadd.f32 %v733_v11, %v717_v10  ;;  %v706_v11 = vpop.xlane.xlu0 %705 }
 0x15b   : > { %765 = vst.msk [vmem:[%s1187_s22 + $0x8] sm:$0xff] %vm433_vm1, %v749_v12 }
 0x15c   : > { %v596_v14 = vpop.f32.mrf.mxu1 }
 0x15d   : > { %v597_v15 = vadd.f32 %v1364_v2, %v596_v14 }
 0x15f   : > { %v734_v17 = vmul.f32 %v676_v13, %v597_v15  ;;  %v728_v13 = vld [vmem:[%s1187_s22 + $0x60] sm:$0xff] }
 0x161   : > { %v750_v18 = vadd.f32 %v734_v17, %v718_v16  ;;  %v709_v17 = vpop.xlane.xlu1 %708 }
 0x163   : > { %766 = vst.msk [vmem:[%s1187_s22 + $0x10] sm:$0xff] %vm433_vm1, %v750_v18 }
 0x164   : > { %v598_v19 = vpop.f32.mrf.mxu1 }
 0x165   : > { %v599_v21 = vadd.f32 %v1364_v2, %v598_v19  ;;  %v729_v19 = vld [vmem:[%s1187_s22 + $0x68] sm:$0xff] }
 0x167   : > { %v735_v24 = vmul.f32 %v679_v20, %v599_v21 }
 0x169   : > { %v751_v25 = vadd.f32 %v735_v24, %v719_v22  ;;  %v712_v24 = vpop.xlane.xlu2 %711 }
 0x16b   : > { %767 = vst.msk [vmem:[%s1187_s22 + $0x18] sm:$0xff] %vm433_vm1, %v751_v25 }
 0x16c   : > { %v601_v27 = vpop.f32.mrf.mxu1 }
 0x16d   : > { %v602_v28 = vadd.f32 %v1364_v2, %v601_v27 }
 0x16f   : > { %v736_v31 = vmul.f32 %v682_v26, %v602_v28  ;;  %v730_v26 = vld [vmem:[%s1187_s22 + $0x70] sm:$0xff] }
 0x171   : > { %v752_v32 = vadd.f32 %v736_v31, %v720_v29  ;;  %v715_v31 = vpop.xlane.xlu0 %714 }
 0x173   : > { %768 = vst.msk [vmem:[%s1187_s22 + $0x20] sm:$0xff] %vm433_vm1, %v752_v32 }
 0x174   : > { %v603_v33 = vpop.f32.mrf.mxu1 }
 0x175   : > { %v604_v35 = vadd.f32 %v1364_v2, %v603_v33  ;;  %v731_v33 = vld [vmem:[%s1187_s22 + $0x78] sm:$0xff] }
 0x177   : > { %v737_v37 = vmul.f32 %v685_v34, %v604_v35 }
 0x179   : > { %v753_v38 = vadd.f32 %v737_v37, %v721_v36 }
 0x17b   : > { %769 = vst.msk [vmem:[%s1187_s22 + $0x28] sm:$0xff] %vm433_vm1, %v753_v38 }
 0x17c   : > { %v606_v39 = vpop.f32.mrf.mxu1 }
 0x17d   : > { %v607_v41 = vadd.f32 %v1364_v2, %v606_v39 }
 0x17f   : > { %v738_v43 = vmul.f32 %v688_v40, %v607_v41 }
 0x181   : > { %v754_v44 = vadd.f32 %v738_v43, %v722_v42 }
 0x183   : > { %770 = vst.msk [vmem:[%s1187_s22 + $0x30] sm:$0xff] %vm433_vm1, %v754_v44 }
 0x184   : > { %v608_v45 = vpop.f32.mrf.mxu1 }
 0x185   : > { %v609_v47 = vadd.f32 %v1364_v2, %v608_v45 }
 0x187   : > { %v739_v49 = vmul.f32 %v691_v46, %v609_v47 }
 0x189   : > { %v755_v50 = vadd.f32 %v739_v49, %v723_v48 }
 0x18b   : > { %771 = vst.msk [vmem:[%s1187_s22 + $0x38] sm:$0xff] %vm433_vm1, %v755_v50 }
 0x192   : > { %v611_v51 = vpop.f32.mrf.mxu2 }
 0x193   : > { %v612_v53 = vadd.f32 %v1364_v2, %v611_v51 }
 0x195   : > { %v740_v55 = vmul.f32 %v694_v52, %v612_v53 }
 0x197   : > { %v756_v56 = vadd.f32 %v740_v55, %v724_v54 }
 0x199   : > { %772 = vst.msk [vmem:[%s1187_s22 + $0x40] sm:$0xff] %vm433_vm1, %v756_v56 }
 0x19a   : > { %v613_v57 = vpop.f32.mrf.mxu2 }
 0x19b   : > { %v614_v59 = vadd.f32 %v1364_v2, %v613_v57 }
 0x19d   : > { %v741_v61 = vmul.f32 %v697_v58, %v614_v59 }
 0x19f   : > { %v757_v62 = vadd.f32 %v741_v61, %v725_v60 }
 0x1a1   : > { %773 = vst.msk [vmem:[%s1187_s22 + $0x48] sm:$0xff] %vm433_vm1, %v757_v62 }
 0x1a2   : > { %v616_v63 = vpop.f32.mrf.mxu2 }
 0x1a3   : > { %v617_v1 = vadd.f32 %v1364_v2, %v616_v63 }
 0x1a5   : > { %v742_v3 = vmul.f32 %v700_v0, %v617_v1 }
 0x1a7   : > { %v758_v23 = vadd.f32 %v742_v3, %v726_v30 }
 0x1a9   : > { %774 = vst.msk [vmem:[%s1187_s22 + $0x50] sm:$0xff] %vm433_vm1, %v758_v23 }
 0x1aa   : > { %v618_v4 = vpop.f32.mrf.mxu2 }
 0x1ab   : > { %v619_v6 = vadd.f32 %v1364_v2, %v618_v4 }
 0x1ad   : > { %v743_v8 = vmul.f32 %v703_v5, %v619_v6 }
 0x1af   : > { %v759_v9 = vadd.f32 %v743_v8, %v727_v7 }
 0x1b1   : > { %775 = vst.msk [vmem:[%s1187_s22 + $0x58] sm:$0xff] %vm433_vm1, %v759_v9 }
 0x1b2   : > { %v621_v10 = vpop.f32.mrf.mxu2 }
 0x1b3   : > { %v622_v12 = vadd.f32 %v1364_v2, %v621_v10 }
 0x1b5   : > { %v744_v14 = vmul.f32 %v706_v11, %v622_v12 }
 0x1b7   : > { %v760_v15 = vadd.f32 %v744_v14, %v728_v13 }
 0x1b9   : > { %776 = vst.msk [vmem:[%s1187_s22 + $0x60] sm:$0xff] %vm433_vm1, %v760_v15 }
 0x1ba   : > { %v623_v16 = vpop.f32.mrf.mxu2 }
 0x1bb   : > { %v624_v18 = vadd.f32 %v1364_v2, %v623_v16 }
 0x1bd   : > { %v745_v20 = vmul.f32 %v709_v17, %v624_v18 }
 0x1bf   : > { %v761_v21 = vadd.f32 %v745_v20, %v729_v19 }
 0x1c1   : > { %777 = vst.msk [vmem:[%s1187_s22 + $0x68] sm:$0xff] %vm433_vm1, %v761_v21 }
 0x1c2   : > { %v626_v22 = vpop.f32.mrf.mxu2 }
 0x1c3   : > { %v627_v25 = vadd.f32 %v1364_v2, %v626_v22 }
 0x1c5   : > { %v746_v27 = vmul.f32 %v712_v24, %v627_v25 }
 0x1c7   : > { %v762_v28 = vadd.f32 %v746_v27, %v730_v26 }
 0x1c9   : > { %778 = vst.msk [vmem:[%s1187_s22 + $0x70] sm:$0xff] %vm433_vm1, %v762_v28 }
 0x1ca   : > { %v628_v29 = vpop.f32.mrf.mxu2 }
 0x1cb   : > { %v629_v32 = vadd.f32 %v1364_v2, %v628_v29 }
 0x1cd   : > { %v747_v34 = vmul.f32 %v715_v31, %v629_v32 }
 0x1cf   : > { %v763_v35 = vadd.f32 %v747_v34, %v731_v33 }
 0x1d1   : > { %779 = vst.msk [vmem:[%s1187_s22 + $0x78] sm:$0xff] %vm433_vm1, %v763_v35 }
 0x1d2 PF: > { %s25_s9 = sadd.s32 1, %s1092_s9   ;;  %s1455_s28 = smov %s1084_s30 }
 0x1d3   : > { %p22_p8 = scmp.ge.s32.totalorder %s25_s9, 18   ;;  %s1456_s29 = smov %s1088_s8 }
 0x1d4   : > { %s1457_s30 = smov %s1460_s0  ;;  %s1458_s8 = smov %s1464_s10 }
 0x1d5   :  { %24 = sbr.rel (!%p22_p8) target bundleno = 9 (0x9), region = 89 }

</bundles_post_ra>
